<compile_context>
chip_gen: v7x
topology: tpu7x:2x2x1
jax: 0.10.0
libtpu: 0.0.40
codegen_flags: <defaults>
</compile_context>

<pallas_src>
import functools

import jax
import jax.numpy as jnp
from jax.experimental import pallas as pl
from jax.experimental.pallas import tpu as pltpu


# -----------------------------------------------------------------------------
# Fused kernel: 3x3 SAME conv + bias + ReLU  ->  global avg pool  ->  linear.
#
# Grid = (B, T):
#   axis 0 (batch)    "parallel"  : independent images (megacore-shardable)
#   axis 1 (row tile) "arbitrary" : reduction axis; pooled sum carried in VMEM
#                                   scratch, head applied on the last step.
#
# The padded image is row-flattened to [ (H+2)*(W+2), Cin ]; each grid step
# loads its TH "wide" output rows plus a 2-row halo and accumulates the 9
# (dh, dw) taps as shifted 2-D matmuls.  Width-padding columns produce junk
# conv outputs which the pooling mask zeroes out.
# -----------------------------------------------------------------------------
def _fused_backbone_head_kernel(x_ref, wc_ref, bc_ref, mask_ref, wh_ref, bh_ref,
                                o_ref, pool_ref, *, TH, P, W, H, Cmid, LOAD_LEN):
    t = pl.program_id(1)
    num_t = pl.num_programs(1)
    MW = TH * P                        # "wide" output rows handled this step

    @pl.when(t == 0)
    def _init():
        pool_ref[...] = jnp.zeros_like(pool_ref)

    # This tile's rows of the flattened padded image (plus 2-row halo).
    base = pl.multiple_of(t * MW, 8)
    xt = x_ref[0, pl.ds(base, LOAD_LEN), :]            # [LOAD_LEN, Cin]

    # 3x3 conv as 9 shifted [MW, Cin] @ [Cin, Cmid] accumulating matmuls.
    acc = jnp.zeros((MW, Cmid), jnp.float32)
    for dh in range(3):
        for dw in range(3):
            off = dh * P + dw
            win = xt[off:off + MW, :]                  # static shifted window
            acc = acc + jnp.dot(win, wc_ref[dh * 3 + dw],
                                preferred_element_type=jnp.float32)
    feat = jnp.maximum(acc + bc_ref[...], 0.0)         # bias + ReLU, [MW, Cmid]

    # Fused global-average-pool: masked column sum on the MXU
    # (mask also zeroes the width-padding junk rows of `feat`).
    pool_ref[...] += jnp.dot(mask_ref[...], feat,
                             preferred_element_type=jnp.float32)

    # Last tile of this image: apply the linear head, emit the logits.
    @pl.when(t == num_t - 1)
    def _finalize():
        pooled = pool_ref[...] * (1.0 / float(H * W))              # [1, Cmid]
        logits = jnp.dot(pooled, wh_ref[...],
                         preferred_element_type=jnp.float32) + bh_ref[...]
        o_ref[0] = logits.astype(o_ref.dtype)                      # [1, NC]


def _forward_impl(x_nchw, w_conv, b_conv, w_head, b_head):
    B, Cin, H, W = x_nchw.shape
    Cmid = w_conv.shape[0]
    NC = w_head.shape[1]
    P = W + 2                                      # padded width

    TH = 8 if H % 8 == 0 else H                    # output rows per grid step
    T = H // TH
    MW = TH * P
    LOAD_LEN = ((MW + 2 * P + 2 + 7) // 8) * 8     # tile + 2-row halo, 8-aligned

    # NCHW -> NHWC, zero-pad spatially (SAME 3x3), flatten (H+2, W+2) -> rows,
    # and add a few trailing zero rows so the last tile's halo load is in-bounds.
    x_nhwc = jnp.transpose(x_nchw, (0, 2, 3, 1))
    xp = jnp.pad(x_nhwc, ((0, 0), (1, 1), (1, 1), (0, 0)))
    xflat = xp.reshape(B, (H + 2) * P, Cin)
    R = ((H - TH) * P + LOAD_LEN + 7) // 8 * 8
    xflat = jnp.pad(xflat, ((0, 0), (0, R - (H + 2) * P), (0, 0)))

    # Conv weight [Cout, Cin, 3, 3] -> [9, Cin, Cout] in (dh, dw)-major order.
    wc = jnp.transpose(w_conv, (2, 3, 1, 0)).reshape(9, Cin, Cmid)
    bc = b_conv.reshape(1, Cmid)
    bh = b_head.reshape(1, NC)

    # Pooling mask over one tile's wide rows: 1 for real pixels, 0 for width pad.
    mask = (jnp.arange(MW) % P < W).astype(jnp.float32).reshape(1, MW)

    kernel = functools.partial(_fused_backbone_head_kernel,
                               TH=TH, P=P, W=W, H=H, Cmid=Cmid, LOAD_LEN=LOAD_LEN)

    flops = 2 * B * H * W * 9 * Cin * Cmid + 2 * B * Cmid * NC
    bytes_accessed = 4 * (xflat.size + wc.size + bc.size + mask.size
                          + w_head.size + bh.size + B * NC)

    out = pl.pallas_call(
        kernel,
        out_shape=jax.ShapeDtypeStruct((B, 1, NC), jnp.float32),
        grid=(B, T),
        in_specs=[
            pl.BlockSpec((1, R, Cin), lambda b, t: (b, 0, 0)),     # image (per batch)
            pl.BlockSpec((9, Cin, Cmid), lambda b, t: (0, 0, 0)),  # conv taps
            pl.BlockSpec((1, Cmid), lambda b, t: (0, 0)),          # conv bias
            pl.BlockSpec((1, MW), lambda b, t: (0, 0)),            # pool mask
            pl.BlockSpec((Cmid, NC), lambda b, t: (0, 0)),         # head weight
            pl.BlockSpec((1, NC), lambda b, t: (0, 0)),            # head bias
        ],
        out_specs=pl.BlockSpec((1, 1, NC), lambda b, t: (b, 0, 0)),
        scratch_shapes=[pltpu.VMEM((1, Cmid), jnp.float32)],       # pooled sum
        compiler_params=pltpu.CompilerParams(
            dimension_semantics=("parallel", "arbitrary"),
            vmem_limit_bytes=32 * 1024 * 1024,
        ),
        cost_estimate=pl.CostEstimate(flops=flops, transcendentals=0,
                                      bytes_accessed=bytes_accessed),
    )(xflat, wc, bc, mask, w_head, bh)
    return out.reshape(B, NC)


_forward = jax.jit(_forward_impl)


class PallasModel:
    """JAX/Pallas stand-in for Model(cfg): conv+ReLU backbone, GAP+linear head."""

    def __init__(self, cin=4, cmid=32, num_classes=10, seed=0):
        k1, k2, k3, k4 = jax.random.split(jax.random.PRNGKey(seed), 4)
        # backbone conv weight in PyTorch layout [Cout, Cin, KH, KW]
        self.w_conv = 0.1 * jax.random.normal(k1, (cmid, cin, 3, 3), jnp.float32)
        self.b_conv = 0.1 * jax.random.normal(k2, (cmid,), jnp.float32)
        # head linear weight [Cmid, num_classes]
        self.w_head = 0.1 * jax.random.normal(k3, (cmid, num_classes), jnp.float32)
        self.b_head = 0.1 * jax.random.normal(k4, (num_classes,), jnp.float32)

    def __call__(self, x_nchw):
        return _forward(x_nchw, self.w_conv, self.b_conv, self.w_head, self.b_head)


# Pure-JAX reference (im2col conv + pool + linear) for a numeric sanity check.
def _reference_forward(x_nchw, w_conv, b_conv, w_head, b_head):
    B, Cin, H, W = x_nchw.shape
    Cmid = w_conv.shape[0]
    x_nhwc = jnp.transpose(x_nchw, (0, 2, 3, 1))
    xp = jnp.pad(x_nhwc, ((0, 0), (1, 1), (1, 1), (0, 0)))
    cols = []
    for dh in range(3):
        for dw in range(3):
            cols.append(xp[:, dh:dh + H, dw:dw + W, :])
    patches = jnp.concatenate(cols, axis=-1).reshape(B * H * W, 9 * Cin)
    wc = jnp.transpose(w_conv, (2, 3, 1, 0)).reshape(9 * Cin, Cmid)
    feats = jnp.maximum(
        jnp.dot(patches, wc, precision=jax.lax.Precision.HIGHEST) + b_conv[None, :], 0.0)
    pooled = jnp.mean(feats.reshape(B, H * W, Cmid), axis=1)
    return jnp.dot(pooled, w_head, precision=jax.lax.Precision.HIGHEST) + b_head[None, :]


if __name__ == "__main__":
    key = jax.random.PRNGKey(0)
    x = jax.random.normal(key, (2, 4, 16, 16), jnp.float32)     # NCHW, like PyTorch
    model = PallasModel(cin=4, cmid=32, num_classes=10, seed=0)

    out = jax.block_until_ready(model(x))
    assert out.shape == (2, 10) and out.dtype == jnp.float32

    ref = jax.block_until_ready(
        _reference_forward(x, model.w_conv, model.b_conv, model.w_head, model.b_head))
    assert bool(jnp.allclose(out, ref, atol=1e-2, rtol=1e-2)), (
        "max abs diff %f" % float(jnp.max(jnp.abs(out - ref))))

    print("KERNEL_OK")
</pallas_src>

<mosaic_0001>
module attributes {stable_mosaic.version = 11 : i64} {
  func.func @_fused_backbone_head_kernel(%arg0: i32, %arg1: i32, %arg2: memref<1x328x4xf32, #tpu.memory_space<vmem>>, %arg3: memref<9x4x32xf32, #tpu.memory_space<vmem>>, %arg4: memref<1x32xf32, #tpu.memory_space<vmem>>, %arg5: memref<1x144xf32, #tpu.memory_space<vmem>>, %arg6: memref<32x10xf32, #tpu.memory_space<vmem>>, %arg7: memref<1x10xf32, #tpu.memory_space<vmem>>, %arg8: memref<1x1x10xf32, #tpu.memory_space<vmem>>, %arg9: memref<1x32xf32, #tpu.memory_space<vmem>>) attributes {dimension_semantics = [#tpu.dimension_semantics<parallel>, #tpu.dimension_semantics<arbitrary>], iteration_bounds = array<i64: 2, 2>, scalar_prefetch = 0 : i64, scratch_operands = 1 : i64, tpu.core_type = #tpu.core_type<tc>, window_params = [{transform_indices = @transform_0, window_bounds = array<i64: 1, 328, 4>}, {pipeline_mode = #tpu.pipeline_mode<synchronous>, transform_indices = @transform_1, window_bounds = array<i64: 9, 4, 32>}, {pipeline_mode = #tpu.pipeline_mode<synchronous>, transform_indices = @transform_2, window_bounds = array<i64: 1, 32>}, {pipeline_mode = #tpu.pipeline_mode<synchronous>, transform_indices = @transform_3, window_bounds = array<i64: 1, 144>}, {pipeline_mode = #tpu.pipeline_mode<synchronous>, transform_indices = @transform_4, window_bounds = array<i64: 32, 10>}, {pipeline_mode = #tpu.pipeline_mode<synchronous>, transform_indices = @transform_5, window_bounds = array<i64: 1, 10>}, {transform_indices = @transform_6, window_bounds = array<i64: 1, 1, 10>}]} {
    %c0_i32 = arith.constant 0 : i32
    %0 = arith.cmpi eq, %arg1, %c0_i32 : i32
    %1 = arith.extui %0 : i1 to i32
    %c0_i32_0 = arith.constant 0 : i32
    %2 = arith.cmpi ne, %1, %c0_i32_0 : i32
    scf.if %2 {
      %cst_41 = arith.constant 0.000000e+00 : f32
      %67 = vector.broadcast %cst_41 : f32 to vector<1x32xf32>
      %c0_42 = arith.constant 0 : index
      %c0_43 = arith.constant 0 : index
      %68 = vector.load %arg9[%c0_42, %c0_43] : memref<1x32xf32, #tpu.memory_space<vmem>>, vector<1x32xf32>
      tpu.vector_store %arg9[%c0_42, %c0_43], %67 {strides = array<i32>} : memref<1x32xf32, #tpu.memory_space<vmem>>, vector<1x32xf32>,
    } else {
    }
    %c144_i32 = arith.constant 144 : i32
    %3 = arith.muli %arg1, %c144_i32 : i32
    %4 = tpu.assume_multiple %3, 8 : i32
    %c0 = arith.constant 0 : index
    %5 = arith.index_cast %4 : i32 to index
    %c0_1 = arith.constant 0 : index
    %6 = vector.load %arg2[%c0, %5, %c0_1] : memref<1x328x4xf32, #tpu.memory_space<vmem>>, vector<1x184x4xf32>
    %7 = vector.shape_cast %6 : vector<1x184x4xf32> to vector<184x4xf32>
    %cst = arith.constant 0.000000e+00 : f32
    %8 = vector.broadcast %cst : f32 to vector<144x32xf32>
    %9 = vector.extract_strided_slice %7 {offsets = [0, 0], sizes = [144, 4], strides = [1, 1]} : vector<184x4xf32> to vector<144x4xf32>
    %c0_2 = arith.constant 0 : index
    %c0_3 = arith.constant 0 : index
    %c0_4 = arith.constant 0 : index
    %10 = vector.load %arg3[%c0_2, %c0_3, %c0_4] : memref<9x4x32xf32, #tpu.memory_space<vmem>>, vector<1x4x32xf32>
    %11 = vector.shape_cast %10 : vector<1x4x32xf32> to vector<4x32xf32>
    %cst_5 = arith.constant dense<0.000000e+00> : vector<144x32xf32>
    %12 = tpu.matmul %9, %11, %cst_5 {dimension_numbers = #tpu.dot_dimension_numbers<[1], [0], [0], [1], [0, 0, 1, 1], [], []>} : vector<144x4xf32>, vector<4x32xf32>, vector<144x32xf32> -> vector<144x32xf32>
    %13 = arith.addf %8, %12 : vector<144x32xf32>
    %14 = vector.extract_strided_slice %7 {offsets = [1, 0], sizes = [144, 4], strides = [1, 1]} : vector<184x4xf32> to vector<144x4xf32>
    %c1 = arith.constant 1 : index
    %c0_6 = arith.constant 0 : index
    %c0_7 = arith.constant 0 : index
    %15 = vector.load %arg3[%c1, %c0_6, %c0_7] : memref<9x4x32xf32, #tpu.memory_space<vmem>>, vector<1x4x32xf32>
    %16 = vector.shape_cast %15 : vector<1x4x32xf32> to vector<4x32xf32>
    %cst_8 = arith.constant dense<0.000000e+00> : vector<144x32xf32>
    %17 = tpu.matmul %14, %16, %cst_8 {dimension_numbers = #tpu.dot_dimension_numbers<[1], [0], [0], [1], [0, 0, 1, 1], [], []>} : vector<144x4xf32>, vector<4x32xf32>, vector<144x32xf32> -> vector<144x32xf32>
    %18 = arith.addf %13, %17 : vector<144x32xf32>
    %19 = vector.extract_strided_slice %7 {offsets = [2, 0], sizes = [144, 4], strides = [1, 1]} : vector<184x4xf32> to vector<144x4xf32>
    %c2 = arith.constant 2 : index
    %c0_9 = arith.constant 0 : index
    %c0_10 = arith.constant 0 : index
    %20 = vector.load %arg3[%c2, %c0_9, %c0_10] : memref<9x4x32xf32, #tpu.memory_space<vmem>>, vector<1x4x32xf32>
    %21 = vector.shape_cast %20 : vector<1x4x32xf32> to vector<4x32xf32>
    %cst_11 = arith.constant dense<0.000000e+00> : vector<144x32xf32>
    %22 = tpu.matmul %19, %21, %cst_11 {dimension_numbers = #tpu.dot_dimension_numbers<[1], [0], [0], [1], [0, 0, 1, 1], [], []>} : vector<144x4xf32>, vector<4x32xf32>, vector<144x32xf32> -> vector<144x32xf32>
    %23 = arith.addf %18, %22 : vector<144x32xf32>
    %24 = vector.extract_strided_slice %7 {offsets = [18, 0], sizes = [144, 4], strides = [1, 1]} : vector<184x4xf32> to vector<144x4xf32>
    %c3 = arith.constant 3 : index
    %c0_12 = arith.constant 0 : index
    %c0_13 = arith.constant 0 : index
    %25 = vector.load %arg3[%c3, %c0_12, %c0_13] : memref<9x4x32xf32, #tpu.memory_space<vmem>>, vector<1x4x32xf32>
    %26 = vector.shape_cast %25 : vector<1x4x32xf32> to vector<4x32xf32>
    %cst_14 = arith.constant dense<0.000000e+00> : vector<144x32xf32>
    %27 = tpu.matmul %24, %26, %cst_14 {dimension_numbers = #tpu.dot_dimension_numbers<[1], [0], [0], [1], [0, 0, 1, 1], [], []>} : vector<144x4xf32>, vector<4x32xf32>, vector<144x32xf32> -> vector<144x32xf32>
    %28 = arith.addf %23, %27 : vector<144x32xf32>
    %29 = vector.extract_strided_slice %7 {offsets = [19, 0], sizes = [144, 4], strides = [1, 1]} : vector<184x4xf32> to vector<144x4xf32>
    %c4 = arith.constant 4 : index
    %c0_15 = arith.constant 0 : index
    %c0_16 = arith.constant 0 : index
    %30 = vector.load %arg3[%c4, %c0_15, %c0_16] : memref<9x4x32xf32, #tpu.memory_space<vmem>>, vector<1x4x32xf32>
    %31 = vector.shape_cast %30 : vector<1x4x32xf32> to vector<4x32xf32>
    %cst_17 = arith.constant dense<0.000000e+00> : vector<144x32xf32>
    %32 = tpu.matmul %29, %31, %cst_17 {dimension_numbers = #tpu.dot_dimension_numbers<[1], [0], [0], [1], [0, 0, 1, 1], [], []>} : vector<144x4xf32>, vector<4x32xf32>, vector<144x32xf32> -> vector<144x32xf32>
    %33 = arith.addf %28, %32 : vector<144x32xf32>
    %34 = vector.extract_strided_slice %7 {offsets = [20, 0], sizes = [144, 4], strides = [1, 1]} : vector<184x4xf32> to vector<144x4xf32>
    %c5 = arith.constant 5 : index
    %c0_18 = arith.constant 0 : index
    %c0_19 = arith.constant 0 : index
    %35 = vector.load %arg3[%c5, %c0_18, %c0_19] : memref<9x4x32xf32, #tpu.memory_space<vmem>>, vector<1x4x32xf32>
    %36 = vector.shape_cast %35 : vector<1x4x32xf32> to vector<4x32xf32>
    %cst_20 = arith.constant dense<0.000000e+00> : vector<144x32xf32>
    %37 = tpu.matmul %34, %36, %cst_20 {dimension_numbers = #tpu.dot_dimension_numbers<[1], [0], [0], [1], [0, 0, 1, 1], [], []>} : vector<144x4xf32>, vector<4x32xf32>, vector<144x32xf32> -> vector<144x32xf32>
    %38 = arith.addf %33, %37 : vector<144x32xf32>
    %39 = vector.extract_strided_slice %7 {offsets = [36, 0], sizes = [144, 4], strides = [1, 1]} : vector<184x4xf32> to vector<144x4xf32>
    %c6 = arith.constant 6 : index
    %c0_21 = arith.constant 0 : index
    %c0_22 = arith.constant 0 : index
    %40 = vector.load %arg3[%c6, %c0_21, %c0_22] : memref<9x4x32xf32, #tpu.memory_space<vmem>>, vector<1x4x32xf32>
    %41 = vector.shape_cast %40 : vector<1x4x32xf32> to vector<4x32xf32>
    %cst_23 = arith.constant dense<0.000000e+00> : vector<144x32xf32>
    %42 = tpu.matmul %39, %41, %cst_23 {dimension_numbers = #tpu.dot_dimension_numbers<[1], [0], [0], [1], [0, 0, 1, 1], [], []>} : vector<144x4xf32>, vector<4x32xf32>, vector<144x32xf32> -> vector<144x32xf32>
    %43 = arith.addf %38, %42 : vector<144x32xf32>
    %44 = vector.extract_strided_slice %7 {offsets = [37, 0], sizes = [144, 4], strides = [1, 1]} : vector<184x4xf32> to vector<144x4xf32>
    %c7 = arith.constant 7 : index
    %c0_24 = arith.constant 0 : index
    %c0_25 = arith.constant 0 : index
    %45 = vector.load %arg3[%c7, %c0_24, %c0_25] : memref<9x4x32xf32, #tpu.memory_space<vmem>>, vector<1x4x32xf32>
    %46 = vector.shape_cast %45 : vector<1x4x32xf32> to vector<4x32xf32>
    %cst_26 = arith.constant dense<0.000000e+00> : vector<144x32xf32>
    %47 = tpu.matmul %44, %46, %cst_26 {dimension_numbers = #tpu.dot_dimension_numbers<[1], [0], [0], [1], [0, 0, 1, 1], [], []>} : vector<144x4xf32>, vector<4x32xf32>, vector<144x32xf32> -> vector<144x32xf32>
    %48 = arith.addf %43, %47 : vector<144x32xf32>
    %49 = vector.extract_strided_slice %7 {offsets = [38, 0], sizes = [144, 4], strides = [1, 1]} : vector<184x4xf32> to vector<144x4xf32>
    %c8 = arith.constant 8 : index
    %c0_27 = arith.constant 0 : index
    %c0_28 = arith.constant 0 : index
    %50 = vector.load %arg3[%c8, %c0_27, %c0_28] : memref<9x4x32xf32, #tpu.memory_space<vmem>>, vector<1x4x32xf32>
    %51 = vector.shape_cast %50 : vector<1x4x32xf32> to vector<4x32xf32>
    %cst_29 = arith.constant dense<0.000000e+00> : vector<144x32xf32>
    %52 = tpu.matmul %49, %51, %cst_29 {dimension_numbers = #tpu.dot_dimension_numbers<[1], [0], [0], [1], [0, 0, 1, 1], [], []>} : vector<144x4xf32>, vector<4x32xf32>, vector<144x32xf32> -> vector<144x32xf32>
    %53 = arith.addf %48, %52 : vector<144x32xf32>
    %c0_30 = arith.constant 0 : index
    %c0_31 = arith.constant 0 : index
    %54 = vector.load %arg4[%c0_30, %c0_31] : memref<1x32xf32, #tpu.memory_space<vmem>>, vector<1x32xf32>
    %55 = vector.broadcast %54 : vector<1x32xf32> to vector<144x32xf32>
    %56 = arith.addf %53, %55 : vector<144x32xf32>
    %cst_32 = arith.constant 0.000000e+00 : f32
    %57 = vector.broadcast %cst_32 : f32 to vector<144x32xf32>
    %58 = arith.maximumf %56, %57 : vector<144x32xf32>
    %c0_33 = arith.constant 0 : index
    %c0_34 = arith.constant 0 : index
    %59 = vector.load %arg9[%c0_33, %c0_34] : memref<1x32xf32, #tpu.memory_space<vmem>>, vector<1x32xf32>
    %c0_35 = arith.constant 0 : index
    %c0_36 = arith.constant 0 : index
    %60 = vector.load %arg5[%c0_35, %c0_36] : memref<1x144xf32, #tpu.memory_space<vmem>>, vector<1x144xf32>
    %cst_37 = arith.constant dense<0.000000e+00> : vector<1x32xf32>
    %61 = tpu.matmul %60, %58, %cst_37 {dimension_numbers = #tpu.dot_dimension_numbers<[1], [0], [0], [1], [0, 0, 1, 1], [], []>} : vector<1x144xf32>, vector<144x32xf32>, vector<1x32xf32> -> vector<1x32xf32>
    %62 = arith.addf %59, %61 : vector<1x32xf32>
    %c0_38 = arith.constant 0 : index
    %c0_39 = arith.constant 0 : index
    %63 = vector.load %arg9[%c0_38, %c0_39] : memref<1x32xf32, #tpu.memory_space<vmem>>, vector<1x32xf32>
    tpu.vector_store %arg9[%c0_38, %c0_39], %62 {strides = array<i32>} : memref<1x32xf32, #tpu.memory_space<vmem>>, vector<1x32xf32>,
    %c1_i32 = arith.constant 1 : i32
    %64 = arith.cmpi eq, %arg1, %c1_i32 : i32
    %65 = arith.extui %64 : i1 to i32
    %c0_i32_40 = arith.constant 0 : i32
    %66 = arith.cmpi ne, %65, %c0_i32_40 : i32
    scf.if %66 {
      %c0_41 = arith.constant 0 : index
      %c0_42 = arith.constant 0 : index
      %67 = vector.load %arg9[%c0_41, %c0_42] : memref<1x32xf32, #tpu.memory_space<vmem>>, vector<1x32xf32>
      %cst_43 = arith.constant 3.906250e-03 : f32
      %68 = vector.broadcast %cst_43 : f32 to vector<1x32xf32>
      %69 = arith.mulf %67, %68 : vector<1x32xf32>
      %c0_44 = arith.constant 0 : index
      %c0_45 = arith.constant 0 : index
      %70 = vector.load %arg6[%c0_44, %c0_45] : memref<32x10xf32, #tpu.memory_space<vmem>>, vector<32x10xf32>
      %cst_46 = arith.constant dense<0.000000e+00> : vector<1x10xf32>
      %71 = tpu.matmul %69, %70, %cst_46 {dimension_numbers = #tpu.dot_dimension_numbers<[1], [0], [0], [1], [0, 0, 1, 1], [], []>} : vector<1x32xf32>, vector<32x10xf32>, vector<1x10xf32> -> vector<1x10xf32>
      %c0_47 = arith.constant 0 : index
      %c0_48 = arith.constant 0 : index
      %72 = vector.load %arg7[%c0_47, %c0_48] : memref<1x10xf32, #tpu.memory_space<vmem>>, vector<1x10xf32>
      %73 = arith.addf %71, %72 : vector<1x10xf32>
      %c0_49 = arith.constant 0 : index
      %c0_50 = arith.constant 0 : index
      %c0_51 = arith.constant 0 : index
      %74 = vector.load %arg8[%c0_49, %c0_50, %c0_51] : memref<1x1x10xf32, #tpu.memory_space<vmem>>, vector<1x1x10xf32>
      %75 = vector.shape_cast %74 : vector<1x1x10xf32> to vector<1x10xf32>
      %76 = vector.shape_cast %73 : vector<1x10xf32> to vector<1x1x10xf32>
      tpu.vector_store %arg8[%c0_49, %c0_50, %c0_51], %76 {strides = array<i32>} : memref<1x1x10xf32, #tpu.memory_space<vmem>>, vector<1x1x10xf32>,
    } else {
    }
    return
  }
  func.func @transform_0(%arg0: i32, %arg1: i32) -> (i32, i32, i32) {
    %c0_i32 = arith.constant 0 : i32
    %c0_i32_0 = arith.constant 0 : i32
    %c0_i32_1 = arith.constant 0 : i32
    return %arg0, %c0_i32, %c0_i32_0 : i32, i32, i32
  }
  func.func @transform_1(%arg0: i32, %arg1: i32) -> (i32, i32, i32) {
    %c0_i32 = arith.constant 0 : i32
    %c0_i32_0 = arith.constant 0 : i32
    %c0_i32_1 = arith.constant 0 : i32
    %c0_i32_2 = arith.constant 0 : i32
    return %c0_i32, %c0_i32_0, %c0_i32_1 : i32, i32, i32
  }
  func.func @transform_2(%arg0: i32, %arg1: i32) -> (i32, i32) {
    %c0_i32 = arith.constant 0 : i32
    %c0_i32_0 = arith.constant 0 : i32
    %c0_i32_1 = arith.constant 0 : i32
    return %c0_i32, %c0_i32_0 : i32, i32
  }
  func.func @transform_3(%arg0: i32, %arg1: i32) -> (i32, i32) {
    %c0_i32 = arith.constant 0 : i32
    %c0_i32_0 = arith.constant 0 : i32
    %c0_i32_1 = arith.constant 0 : i32
    return %c0_i32, %c0_i32_0 : i32, i32
  }
  func.func @transform_4(%arg0: i32, %arg1: i32) -> (i32, i32) {
    %c0_i32 = arith.constant 0 : i32
    %c0_i32_0 = arith.constant 0 : i32
    %c0_i32_1 = arith.constant 0 : i32
    return %c0_i32, %c0_i32_0 : i32, i32
  }
  func.func @transform_5(%arg0: i32, %arg1: i32) -> (i32, i32) {
    %c0_i32 = arith.constant 0 : i32
    %c0_i32_0 = arith.constant 0 : i32
    %c0_i32_1 = arith.constant 0 : i32
    return %c0_i32, %c0_i32_0 : i32, i32
  }
  func.func @transform_6(%arg0: i32, %arg1: i32) -> (i32, i32, i32) {
    %c0_i32 = arith.constant 0 : i32
    %c0_i32_0 = arith.constant 0 : i32
    %c0_i32_1 = arith.constant 0 : i32
    return %arg0, %c0_i32, %c0_i32_0 : i32, i32, i32
  }
}

</mosaic_0001>

<bundles_post_ra>
// kernel: _forward_impl.1
= control target key start
LH: loop header
LB: loop body
LE: loop exit
PB: predicated region body
PF: predicated region fallthrough
CT: control target
= control target key end

     0   :  { %11 = vsyncpa [#allocation4], 0  ;;  %s4700_s0 = inlined_call_operand.vmem [shape: f32[2,328,4], index: 0, kind: input, shape index: {}]   ;;  %s4701_s1 = inlined_call_operand.vmem [shape: f32[9,4,32], index: 1, kind: input, shape index: {}]   ;;  %s4702_s2 = inlined_call_operand.vmem [shape: f32[1,32], index: 2, kind: input, shape index: {}]   ;;  %s4703_s3 = inlined_call_operand.vmem [shape: f32[1,144], index: 3, kind: input, shape index: {}]   ;;  %s4704_s4 = inlined_call_operand.vmem [shape: f32[32,10], index: 4, kind: input, shape index: {}]   ;;  %s4705_s5 = inlined_call_operand.vmem [shape: f32[1,10], index: 5, kind: input, shape index: {}]   ;;  %s4706_s6 = inlined_call_operand.hbm [shape: f32[2,1,10], index: 6, kind: output, shape index: {}]  }
   0x1   :  { %13 = vsyncpa [#allocation4 + $0x1], 0  ;;  %s3708_s21 = smov 0   ;;  %s3710_s22 = smov 0  }
   0x2   :  { %s3712_s23 = smov 0   ;;  %s3714_s24 = smov 0  }
   0x3   :  { %s3716_s25 = smov 0   ;;  %s3718_s26 = smov 0  }
   0x4   :  { %s3720_s27 = smov 0   ;;  %s3722_s28 = smov 0  }
   0x5 LB: > { %s2676_s29 = sadd.s32 4294967295, %s3665_s28   ;;  %s2677_s30 = sadd.s32 4294967294, %s3665_s28   ;;  %s3665_s28 = sphi %s3722_s28, %s19_s28   ;;  %s3661_s27 = sphi %s3720_s27, %s4773_s27   ;;  %s3657_s26 = sphi %s3718_s26, %s4772_s26   ;;  %s3653_s25 = sphi %s3716_s25, %s4771_s25   ;;  %s3649_s24 = sphi %s3714_s24, %s4770_s24   ;;  %s3645_s23 = sphi %s3712_s23, %s4769_s23   ;;  %s3641_s22 = sphi %s3710_s22, %s4768_s22   ;;  %s3637_s21 = sphi %s3708_s21, %s4767_s21  }
   0x6   : > { %s28_s7 = sadd.s32 1, %s3657_s26  ;;  %s31_s8 = sadd.s32 1, %s3661_s27 }
   0x7   : > { %p29_p0 = scmp.ge.s32.totalorder %s28_s7, 2  ;;  %p179_p1 = scmp.ne.s32.totalorder %s3645_s23, %s3641_s22 }
   0x8   : > { %p180_p2 = scmp.eq.s32.totalorder %s2676_s29, 3  ;;  %p185_p4 = scmp.ne.s32.totalorder %s3641_s22, %s3637_s21 }
   0x9   : > { %s4775_s7 = smov (%p29_p0, %s28_s7), 0  ;;  %s4777_s8 = smov (!%p29_p0, %s31_s8), %s3661_s27 }
   0xa   : > { %p3757_p3 = por %p180_p2, %p179_p1  ;;  %p33_p5 = scmp.ge.s32.totalorder %s4777_s8, 2 }
   0xb   : > { %p186_p6 = scmp.eq.s32.totalorder %s2677_s30, 3  ;;  %p2680_p7 = scmp.ge.s32.totalorder %s3665_s28, 1 }
   0xc   : > { %p227_p8 = scmp.lt.s32.totalorder %s3665_s28, 5  ;;  %s4779_s8 = smov (%p33_p5, %s4777_s8), 0 }
   0xd   : > { %p3767_p9 = por %p186_p6, %p185_p4  ;;  %s166_s11 = ssub.s32 %s3661_s27, %s4779_s8 }
   0xe   : > { %p228_p10 = pnand %p2680_p7, %p227_p8  ;;  %s169_s12 = sadd.s32 1, %s3645_s23 }
   0xf   : > { %p167_p11 = scmp.eq.s32.totalorder %s166_s11, 0 }
  0x10   : > { %231 = sbr.rel (%p228_p10) target bundleno = 905 (0x389), region = 44 }
  0x11   : > { %s3775_s13 = scalar_select %p167_p11, %s3645_s23, %s169_s12  }
  0x17   : > { %s254_s14 = sand.u32 1, %s3641_s22   ;;  %p256_p12 = scmp.lt.s32.totalorder %s3653_s25, 1 }
  0x18   : > { %s3785_s20 = scalar_lea.vmem [#allocation3], %s254_s14  ;;  %p2682_p13 = scmp.ne.s32.totalorder %s3649_s24, 0 }
  0x19   : > { %s257_s15 = scalar_select %p256_p12, %s3653_s25, 1 }
  0x1a   : > { %264 = sbr.rel (%p2682_p13) target bundleno = 33 (0x21), region = 48  ;;  %vm265_vm0 = vcmask (!%p2682_p13), 253952   ;;  %v3667_v0 = vmov (!%p2682_p13), 0.0  }
  0x1b   : > { %s3494_s16 = smul.u32 328, %s257_s15  ;;  %266 = vst.msk [vmem:[#allocation2] sm:$0x1] (!%p2682_p13), %vm265_vm0, %v3667_v0 }
  0x1d   : > { %s260_s19 = scalar_lea.vmem %s4700_s0, %s3494_s16 }
  0x21 PF: > { %v2683_v1 = vld [vmem:[%s4701_s1 + $0x4] sm:$0xf]  ;;  %vm389_vm1 = vcmask 1043456   ;;  %v2762_v2 = vld [vmem:[%s4701_s1 + $0x10] sm:$0xf]  ;;  %s267_s15 = smul.u32 144, %s3649_s24 }
  0x22   : > { %3045 = vmatprep.subr.msk.mxu1 %vm389_vm1, %v2683_v1  ;;  %3161 = vmatprep.subr.msk.mxu0 %vm389_vm1, %v2762_v2  ;;  %v2782_v3 = vld [vmem:[%s4701_s1 + $0x14] sm:$0xf]  ;;  %v292_v4 = vld [vmem:[%s4701_s1] sm:$0xf]  ;;  %vm314_vm2 = vcmask 1046528   ;;  %vm352_vm3 = vcmask 31744  }
  0x23   : > { %3046 = vmatpush3.msk.msra.mxu1 %vm389_vm1, %v2683_v1  ;;  %s3801_s18 = scalar_lea.vmem %s260_s19, %s267_s15  ;;  %3162 = vmatpush3.msk.msra.mxu0 %vm389_vm1, %v2762_v2  ;;  %vm1184_vm4 = vcmask 1044480   ;;  %v3867_v35 = vld [vmem:[%s4701_s1 + $0x18] sm:$0xf]  ;;  %v3884_v43 = vld [vmem:[%s4701_s1 + $0x8] sm:$0xf]  ;;  %vm744_vm5 = vcmask 1045504  }
  0x24   : > { %v3808_v5 = vld [vmem:[%s3801_s18] sm:$0xff]  ;;  %v3811_v6 = vld [vmem:[%s3801_s18 + $0x8] sm:$0xff]  ;;  %v3814_v7 = vld [vmem:[%s3801_s18 + $0x10] sm:$0xff]  ;;  %3190 = vmatprep.subr.msk.mxu0 %vm389_vm1, %v2782_v3  ;;  %3074 = vmatprep.subr.msk.mxu1 %vm389_vm1, %v292_v4  ;;  %vm1875_vm6 = vcmask 1042432   ;;  %vm2127_vm7 = vcmask 1041408   ;;  %vm2432_vm8 = vcmask 130048  }
  0x25   : > { %v315_v8 = vrot.slane %v3808_v5, 1  ;;  %v316_v9 = vrot.slane %v3811_v6, 1  ;;  %v3821_v10 = vld [vmem:[%s3801_s18 + $0x18] sm:$0xff]  ;;  %v1185_v11 = vrot.slane %v3814_v7, 3  ;;  %v318_v12 = vrot.slane %v3814_v7, 1  ;;  %v3826_v13 = vld [vmem:[%s3801_s18 + $0x20] sm:$0xff] }
  0x26   : > { %v1186_v14 = vrot.slane %v3821_v10, 3  ;;  %v1188_v15 = vrot.slane %v3826_v13, 3  ;;  %v320_v16 = vrot.slane %v3821_v10, 1  ;;  %v3832_v17 = vld [vmem:[%s3801_s18 + $0x28] sm:$0xff]  ;;  %v322_v18 = vrot.slane %v3826_v13, 1  ;;  %v3836_v19 = vld [vmem:[%s3801_s18 + $0x30] sm:$0xff] }
  0x27   : > { %v317_v20 = vsel %vm314_vm2, %v315_v8, %v316_v9  ;;  %v319_v21 = vsel %vm314_vm2, %v316_v9, %v318_v12  ;;  %v1190_v22 = vrot.slane %v3832_v17, 3  ;;  %v1192_v23 = vrot.slane %v3836_v19, 3  ;;  %v3843_v24 = vld [vmem:[%s3801_s18 + $0x38] sm:$0xff]  ;;  %v3850_v28 = vld [vmem:[%s3801_s18 + $0x40] sm:$0xff]  ;;  %v3858_v32 = vld [vmem:[%s3801_s18 + $0x48] sm:$0xff]  ;;  %p2864_p0 = scmp.ne.s32.totalorder %s3649_s24, 1 }
  0x28   : > { %3047 = vmatprep.mubr.msk.f32.mxu1 %vm352_vm3, %v317_v20  ;;  %v1187_v25 = vsel %vm1184_vm4, %v1185_v11, %v1186_v14  ;;  %v1189_v26 = vsel %vm1184_vm4, %v1186_v14, %v1188_v15  ;;  %v321_v27 = vsel %vm314_vm2, %v318_v12, %v320_v16  ;;  %v324_v30 = vrot.slane %v3832_v17, 1  ;;  %v3878_v42 = vld [vmem:[%s3801_s18 + $0x50] sm:$0xff]  ;;  %v3888_v44 = vld [vmem:[%s3801_s18 + $0x58] sm:$0xff]  ;;  %v3897_v47 = vld [vmem:[%s3801_s18 + $0x60] sm:$0xff] }
  0x29   : > { %3163 = vmatprep.mubr.msk.f32.mxu0 %vm352_vm3, %v1187_v25  ;;  %3048 = vmatmul.mubr.msk.f32.vlgmr.msra.gmra.mrb[0].mxu1 %vm352_vm3, %v319_v21  ;;  %v1191_v29 = vsel %vm1184_vm4, %v1188_v15, %v1190_v22  ;;  %v1194_v31 = vrot.slane %v3843_v24, 3  ;;  %v323_v33 = vsel %vm314_vm2, %v320_v16, %v322_v18  ;;  %v326_v34 = vrot.slane %v3836_v19, 1  ;;  %v3900_v48 = vld [vmem:[%s3801_s18 + $0x68] sm:$0xff]  ;;  %v3908_v53 = vld [vmem:[%s3801_s18 + $0x70] sm:$0xff]  ;;  %v3915_v56 = vld [vmem:[%s3801_s18 + $0x78] sm:$0xff] }
  0x2a   : > { %3164 = vmatmul.mubr.msk.f32.vlgmr.msra.gmra.mrb[0].mxu0 %vm352_vm3, %v1189_v26  ;;  %3050 = vmatprep.mubr.msk.f32.mxu1 %vm352_vm3, %v321_v27  ;;  %v1193_v36 = vsel %vm1184_vm4, %v1190_v22, %v1192_v23  ;;  %v325_v37 = vsel %vm314_vm2, %v322_v18, %v324_v30  ;;  %v1196_v38 = vrot.slane %v3850_v28, 3  ;;  %v328_v39 = vrot.slane %v3843_v24, 1  ;;  %v3938_v11 = vld [vmem:[%s3801_s18 + $0x88] sm:$0xff]  ;;  %v3946_v18 = vld [vmem:[%s3801_s18 + $0x90] sm:$0xff]  ;;  %v3949_v20 = vld [vmem:[%s3801_s18 + $0x98] sm:$0xff] }
  0x2b   : > { %3191 = vmatpush3.msk.msra.mxu0 %vm389_vm1, %v2782_v3  ;;  %3166 = vmatprep.mubr.msk.f32.mxu0 %vm352_vm3, %v1191_v29  ;;  %v1195_v40 = vsel %vm1184_vm4, %v1192_v23, %v1194_v31  ;;  %v1198_v41 = vrot.slane %v3858_v32, 3  ;;  %v327_v45 = vsel %vm314_vm2, %v324_v30, %v326_v34  ;;  %v330_v46 = vrot.slane %v3850_v28, 1  ;;  %v3958_v26 = vld [vmem:[%s3801_s18 + $0xa0] sm:$0xff] }
  0x2c   : > { %3075 = vmatpush3.msk.msra.mxu1 %vm389_vm1, %v292_v4  ;;  %3219 = vmatprep.subr.msk.mxu0 %vm389_vm1, %v3867_v35  ;;  %v1197_v49 = vsel %vm1184_vm4, %v1194_v31, %v1196_v38  ;;  %v329_v50 = vsel %vm314_vm2, %v326_v34, %v328_v39  ;;  %v1200_v51 = vrot.slane %v3878_v42, 3  ;;  %v332_v52 = vrot.slane %v3858_v32, 1  ;;  %v3933_v4 = vld [vmem:[%s3801_s18 + $0x80] sm:$0xff] }
  0x2d   : > { %3051 = vmatmul.mubr.msk.f32.gmra.mrb[2].mxu1 %vm352_vm3, %v323_v33  ;;  %3103 = vmatprep.subr.msk.mxu1 %vm389_vm1, %v3884_v43  ;;  %v1199_v54 = vsel %vm1184_vm4, %v1196_v38, %v1198_v41  ;;  %v1202_v55 = vrot.slane %v3888_v44, 3  ;;  %v334_v57 = vrot.slane %v3878_v42, 1  ;;  %v1204_v58 = vrot.slane %v3897_v47, 3 }
  0x2e   : > { %3167 = vmatmul.mubr.msk.f32.gmra.mrb[2].mxu0 %vm352_vm3, %v1193_v36  ;;  %3053 = vmatprep.mubr.msk.f32.mxu1 %vm352_vm3, %v325_v37  ;;  %v336_v59 = vrot.slane %v3888_v44, 1  ;;  %v1206_v60 = vrot.slane %v3900_v48, 3  ;;  %v331_v61 = vsel %vm314_vm2, %v328_v39, %v330_v46  ;;  %v338_v62 = vrot.slane %v3897_v47, 1 }
  0x2f   : > { %3169 = vmatprep.mubr.msk.f32.mxu0 %vm352_vm3, %v1195_v40  ;;  %v1208_v63 = vrot.slane %v3908_v53, 3  ;;  %v1201_v0 = vsel %vm1184_vm4, %v1198_v41, %v1200_v51  ;;  %v333_v1 = vsel %vm314_vm2, %v330_v46, %v332_v52  ;;  %v340_v2 = vrot.slane %v3900_v48, 1 }
  0x30   : > { %v1210_v3 = vrot.slane %v3915_v56, 3  ;;  %v1203_v8 = vsel %vm1184_vm4, %v1200_v51, %v1202_v55  ;;  %v342_v9 = vrot.slane %v3908_v53, 1  ;;  %v335_v12 = vsel %vm314_vm2, %v332_v52, %v334_v57 }
  0x31   : > { %3054 = vmatmul.mubr.msk.f32.gmra.mrb[4].mxu1 %vm352_vm3, %v327_v45  ;;  %v1205_v14 = vsel %vm1184_vm4, %v1202_v55, %v1204_v58  ;;  %v337_v15 = vsel %vm314_vm2, %v334_v57, %v336_v59  ;;  %v1207_v16 = vsel %vm1184_vm4, %v1204_v58, %v1206_v60  ;;  %v339_v21 = vsel %vm314_vm2, %v336_v59, %v338_v62 }
  0x32   : > { %3170 = vmatmul.mubr.msk.f32.gmra.mrb[4].mxu0 %vm352_vm3, %v1197_v49  ;;  %3056 = vmatprep.mubr.msk.f32.mxu1 %vm352_vm3, %v329_v50  ;;  %v1209_v22 = vsel %vm1184_vm4, %v1206_v60, %v1208_v63  ;;  %v1212_v23 = vrot.slane %v3933_v4, 3  ;;  %v344_v25 = vrot.slane %v3915_v56, 1  ;;  %v341_v27 = vsel %vm314_vm2, %v338_v62, %v340_v2 }
  0x33   : > { %3172 = vmatprep.mubr.msk.f32.mxu0 %vm352_vm3, %v1199_v54  ;;  %v1211_v29 = vsel %vm1184_vm4, %v1208_v63, %v1210_v3  ;;  %v1214_v30 = vrot.slane %v3938_v11, 3  ;;  %v346_v31 = vrot.slane %v3933_v4, 1  ;;  %v343_v33 = vsel %vm314_vm2, %v340_v2, %v342_v9 }
  0x34   : > { %v1216_v34 = vrot.slane %v3946_v18, 3  ;;  %v348_v36 = vrot.slane %v3938_v11, 1  ;;  %v1218_v37 = vrot.slane %v3949_v20, 3  ;;  %v350_v38 = vrot.slane %v3946_v18, 1 }
  0x35   : > { %3057 = vmatmul.mubr.msk.f32.gmra.mrb[6].mxu1 %vm352_vm3, %v331_v61  ;;  %v1220_v39 = vrot.slane %v3958_v26, 3  ;;  %v1436_v40 = vrot.slane %v3814_v7, 4  ;;  %v1437_v41 = vrot.slane %v3821_v10, 4  ;;  %v1213_v45 = vsel %vm1184_vm4, %v1210_v3, %v1212_v23 }
  0x36   : > { %3173 = vmatmul.mubr.msk.f32.gmra.mrb[6].mxu0 %vm352_vm3, %v1201_v0  ;;  %3059 = vmatprep.mubr.msk.f32.mxu1 %vm352_vm3, %v333_v1  ;;  %v1439_v46 = vrot.slane %v3826_v13, 4  ;;  %v1441_v49 = vrot.slane %v3832_v17, 4  ;;  %v1443_v50 = vrot.slane %v3836_v19, 4  ;;  %v345_v51 = vsel %vm314_vm2, %v342_v9, %v344_v25 }
  0x37   : > { %3175 = vmatprep.mubr.msk.f32.mxu0 %vm352_vm3, %v1203_v8  ;;  %v1215_v52 = vsel %vm1184_vm4, %v1212_v23, %v1214_v30  ;;  %v347_v54 = vsel %vm314_vm2, %v344_v25, %v346_v31  ;;  %v1445_v55 = vrot.slane %v3843_v24, 4  ;;  %v1217_v57 = vsel %vm1184_vm4, %v1214_v30, %v1216_v34 }
  0x38   : > { %v349_v58 = vsel %vm314_vm2, %v346_v31, %v348_v36  ;;  %v1219_v59 = vsel %vm1184_vm4, %v1216_v34, %v1218_v37  ;;  %v1447_v60 = vrot.slane %v3850_v28, 4  ;;  %v351_v61 = vsel %vm314_vm2, %v348_v36, %v350_v38 }
  0x39   : > { %3060 = vmatmul.mubr.msk.f32.gmra.mrb[8].mxu1 %vm352_vm3, %v335_v12  ;;  %v3992_v62 = vsel %vm1184_vm4, %v1218_v37, %v1220_v39  ;;  %v3995_v63 = vsel %vm389_vm1, %v1436_v40, %v1437_v41  ;;  %v1449_v0 = vrot.slane %v3858_v32, 4  ;;  %v4001_v1 = vsel %vm389_vm1, %v1437_v41, %v1439_v46 }
  0x3a   : > { %3176 = vmatmul.mubr.msk.f32.gmra.mrb[8].mxu0 %vm352_vm3, %v1205_v14  ;;  %3062 = vmatprep.mubr.msk.f32.mxu1 %vm352_vm3, %v337_v15  ;;  %v4004_v2 = vsel %vm389_vm1, %v1439_v46, %v1441_v49  ;;  %v4007_v3 = vsel %vm389_vm1, %v1441_v49, %v1443_v50  ;;  %v4011_v8 = vsel %vm389_vm1, %v1443_v50, %v1445_v55  ;;  %v1451_v9 = vrot.slane %v3878_v42, 4 }
  0x3b   : > { %3178 = vmatprep.mubr.msk.f32.mxu0 %vm352_vm3, %v1207_v16  ;;  %v1453_v12 = vrot.slane %v3888_v44, 4  ;;  %v745_v14 = vrot.slane %v3808_v5, 2  ;;  %v4017_v15 = vsel %vm389_vm1, %v1445_v55, %v1447_v60  ;;  %v4707_v16 = vrot.slane %v3897_v47, 4 }
  0x3c   : > { %v4024_v23 = vsel %vm389_vm1, %v1447_v60, %v1449_v0  ;;  %v748_v25 = vrot.slane %v3814_v7, 2  ;;  %v754_v31 = vrot.slane %v3832_v17, 2  ;;  %v758_v34 = vrot.slane %v3843_v24, 2 }
  0x3d   : > { %3063 = vmatmul.mubr.msk.f32.gmra.mrb[10].mxu1 %vm352_vm3, %v339_v21  ;;  %v760_v39 = vrot.slane %v3850_v28, 2  ;;  %v762_v46 = vrot.slane %v3858_v32, 2  ;;  %v764_v50 = vrot.slane %v3878_v42, 2  ;;  %v770_v60 = vrot.slane %v3900_v48, 2 }
  0x3e   : > { %3179 = vmatmul.mubr.msk.f32.gmra.mrb[10].mxu0 %vm352_vm3, %v1209_v22  ;;  %3065 = vmatprep.mubr.msk.f32.mxu1 %vm352_vm3, %v341_v27  ;;  %v746_v22 = vrot.slane %v3811_v6, 2  ;;  %v750_v27 = vrot.slane %v3821_v10, 2  ;;  %v1895_v21 = vrot.slane %v3908_v53, 5  ;;  %vm2506_vm9 = vcmask 253952  }
  0x3f   : > { %3181 = vmatprep.mubr.msk.f32.mxu0 %vm352_vm3, %v1211_v29  ;;  %v752_v29 = vrot.slane %v3826_v13, 2  ;;  %v4060_v49 = vsel %vm744_vm5, %v758_v34, %v760_v39  ;;  %v4068_v55 = vsel %vm744_vm5, %v760_v39, %v762_v46  ;;  %vm3670_vm10 = vmmov (!%p2864_p0), 0  }
  0x40   : > { %v4032_v30 = vsel %vm744_vm5, %v745_v14, %v746_v22  ;;  %v4039_v36 = vsel %vm744_vm5, %v746_v22, %v748_v25  ;;  %v4042_v37 = vsel %vm744_vm5, %v748_v25, %v750_v27  ;;  %v774_v14 = vrot.slane %v3915_v56, 2 }
  0x41   : > { %3066 = vmatmul.mubr.msk.f32.gmra.mrb[12].mxu1 %vm352_vm3, %v343_v33  ;;  %v756_v33 = vrot.slane %v3836_v19, 2  ;;  %v4045_v38 = vsel %vm744_vm5, %v750_v27, %v752_v29  ;;  %v4049_v40 = vsel %vm744_vm5, %v752_v29, %v754_v31  ;;  %v4075_v22 = vsel %vm744_vm5, %v762_v46, %v764_v50 }
  0x42   : > { %3182 = vmatmul.mubr.msk.f32.gmra.mrb[12].mxu0 %vm352_vm3, %v1213_v45  ;;  %3068 = vmatprep.mubr.msk.f32.mxu1 %vm352_vm3, %v345_v51  ;;  %v766_v51 = vrot.slane %v3888_v44, 2  ;;  %v780_v46 = vrot.slane %v3946_v18, 2  ;;  %vm2519_vm11 = vcmask (!%p2864_p0), 261120   ;;  %vm2593_vm12 = vcmask (!%p2864_p0), 73728  }
  0x43   : > { %3184 = vmatprep.mubr.msk.f32.mxu0 %vm352_vm3, %v1215_v52  ;;  %v4052_v41 = vsel %vm744_vm5, %v754_v31, %v756_v33  ;;  %v4055_v45 = vsel %vm744_vm5, %v756_v33, %v758_v34  ;;  %v768_v52 = vrot.slane %v3897_v47, 2  ;;  %v4096_v33 = vsel %vm389_vm1, %v1449_v0, %v1451_v9 }
  0x44   : > { %v4078_v25 = vsel %vm744_vm5, %v764_v50, %v766_v51  ;;  %v4099_v34 = vsel %vm389_vm1, %v1451_v9, %v1453_v12  ;;  %v1877_v0 = vrot.slane %v3832_v17, 5  ;;  %v1879_v9 = vrot.slane %v3836_v19, 5 }
  0x45   : > { %3069 = vmatmul.mubr.msk.f32.gmra.mrb[14].mxu1 %vm352_vm3, %v347_v54  ;;  %v772_v54 = vrot.slane %v3908_v53, 2  ;;  %v4085_v27 = vsel %vm744_vm5, %v768_v52, %v770_v60 }
  0x46   : > { %3185 = vmatmul.mubr.msk.f32.gmra.mrb[14].mxu0 %vm352_vm3, %v1217_v57  ;;  %3071 = vmatprep.mubr.msk.f32.mxu1 %vm352_vm3, %v349_v58  ;;  %v4081_v57 = vsel %vm744_vm5, %v766_v51, %v768_v52  ;;  %v776_v58 = vrot.slane %v3933_v4, 2  ;;  %v4120_v51 = vsel %vm389_vm1, %v1453_v12, %v4707_v16  ;;  %v1881_v52 = vrot.slane %v3843_v24, 5  ;;  %v4140_v12 = vld [vmem:[%s4701_s1 + $0x1c] sm:$0xf] }
  0x47   : > { %3187 = vmatprep.mubr.msk.f32.mxu0 %vm352_vm3, %v1219_v59  ;;  %v4088_v29 = vsel %vm744_vm5, %v770_v60, %v772_v54  ;;  %v4091_v31 = vsel %vm744_vm5, %v772_v54, %v774_v14  ;;  %v778_v59 = vrot.slane %v3938_v11, 2  ;;  %v4131_v54 = vsel %vm1875_vm6, %v1877_v0, %v1879_v9 }
  0x48   : > { %v4102_v39 = vsel %vm744_vm5, %v774_v14, %v776_v58  ;;  %v1885_v14 = vrot.slane %v3858_v32, 5  ;;  %v1893_v16 = vrot.slane %v3900_v48, 5 }
  0x49   : > { %3072 = vmatmul.mubr.msk.f32.gmra.mrb[16].mxu1 %vm352_vm3, %v351_v61  ;;  %v4110_v50 = vsel %vm744_vm5, %v776_v58, %v778_v59  ;;  %v1876_v61 = vrot.slane %v3826_v13, 5  ;;  %v4143_v58 = vsel %vm1875_vm6, %v1879_v9, %v1881_v52 }
  0x4a   : > { %3188 = vmatmul.mubr.msk.f32.gmra.mrb[16].mxu0 %vm352_vm3, %v3992_v62  ;;  %3076 = vmatprep.mubr.msk.f32.mxu1 %vm352_vm3, %v3808_v5  ;;  %v4124_v5 = vsel %vm744_vm5, %v778_v59, %v780_v46  ;;  %v1887_v59 = vrot.slane %v3878_v42, 5 }
  0x4b   : > { %3192 = vmatprep.mubr.msk.f32.mxu0 %vm352_vm3, %v3995_v63  ;;  %v4128_v60 = vsel %vm1875_vm6, %v1876_v61, %v1877_v0  ;;  %v1883_v63 = vrot.slane %v3850_v28, 5  ;;  %v1889_v61 = vrot.slane %v3888_v44, 5  ;;  %v1891_v0 = vrot.slane %v3897_v47, 5 }
  0x4d   : > { %3077 = vmatmul.mubr.msk.f32.vlgmr.msra.gmra.mrb[0].mxu1 %vm352_vm3, %v3811_v6  ;;  %v4155_v6 = vld [vmem:[%s4701_s1 + $0xc] sm:$0xf]  ;;  %v4158_v9 = vsel %vm1875_vm6, %v1881_v52, %v1883_v63  ;;  %v4161_v62 = vsel %vm1875_vm6, %v1883_v63, %v1885_v14  ;;  %v4176_v52 = vsel %vm1875_vm6, %v1889_v61, %v1891_v0  ;;  %v1897_v63 = vrot.slane %v3915_v56, 5 }
  0x4e   : > { %3193 = vmatmul.mubr.msk.f32.vlgmr.msra.gmra.mrb[0].mxu0 %vm352_vm3, %v4001_v1  ;;  %3079 = vmatprep.mubr.msk.f32.mxu1 %vm352_vm3, %v3814_v7  ;;  %4710 = vst [vmem:[#allocation6_spill] sm:$0xff] %v4161_v62  ;;  %v4170_v7 = vsel %vm1875_vm6, %v1885_v14, %v1887_v59  ;;  %v4173_v1 = vsel %vm1875_vm6, %v1887_v59, %v1889_v61  ;;  %4713 = vst [vmem:[#allocation9_spill] sm:$0xff] %v4176_v52  ;;  %v1899_v59 = vrot.slane %v3933_v4, 5  ;;  %v4194_v61 = vld [vmem:[%s3801_s18 + $0xa8] sm:$0xff] }
  0x4f   : > { %3220 = vmatpush3.msk.msra.mxu0 %vm389_vm1, %v3867_v35  ;;  %3195 = vmatprep.mubr.msk.f32.mxu0 %vm352_vm3, %v4004_v2  ;;  %4711 = vst [vmem:[#allocation7_spill] sm:$0xff] %v4170_v7  ;;  %4712 = vst [vmem:[#allocation8_spill] sm:$0xff] %v4173_v1  ;;  %v4184_v35 = vsel %vm1875_vm6, %v1891_v0, %v1893_v16  ;;  %v4187_v14 = vsel %vm1875_vm6, %v1893_v16, %v1895_v21  ;;  %v1901_v1 = vrot.slane %v3938_v11, 5 }
  0x50   : > { %3104 = vmatpush3.msk.msra.mxu1 %vm389_vm1, %v3884_v43  ;;  %3248 = vmatprep.subr.msk.mxu0 %vm389_vm1, %v4140_v12  ;;  %4714 = vst [vmem:[#allocation10_spill] sm:$0xff] %v4184_v35  ;;  %4715 = vst [vmem:[#allocation11_spill] sm:$0xff] %v4187_v14  ;;  %v4199_v43 = vsel %vm1875_vm6, %v1895_v21, %v1897_v63  ;;  %v1903_v0 = vrot.slane %v3946_v18, 5  ;;  %v1905_v16 = vrot.slane %v3949_v20, 5  ;;  %v1907_v14 = vrot.slane %v3958_v26, 5 }
  0x51   : > { %3080 = vmatmul.mubr.msk.f32.gmra.mrb[2].mxu1 %vm352_vm3, %v3821_v10  ;;  %3132 = vmatprep.subr.msk.mxu1 %vm389_vm1, %v4155_v6  ;;  %4716 = vst [vmem:[#allocation12_spill] sm:$0xff] %v4199_v43  ;;  %v4209_v10 = vsel %vm1875_vm6, %v1897_v63, %v1899_v59  ;;  %v4212_v35 = vsel %vm1875_vm6, %v1899_v59, %v1901_v1  ;;  %v998_v21 = vrot.slane %v3949_v20, 2  ;;  %v1000_v63 = vrot.slane %v3958_v26, 2 }
  0x52   : > { %3196 = vmatmul.mubr.msk.f32.gmra.mrb[2].mxu0 %vm352_vm3, %v4007_v3  ;;  %3082 = vmatprep.mubr.msk.f32.mxu1 %vm352_vm3, %v3826_v13  ;;  %4717 = vst [vmem:[#allocation13_spill] sm:$0xff] %v4209_v10  ;;  %4718 = vst [vmem:[#allocation14_spill] sm:$0xff] %v4212_v35  ;;  %v4219_v52 = vsel %vm1875_vm6, %v1901_v1, %v1903_v0  ;;  %v4222_v7 = vsel %vm1875_vm6, %v1903_v0, %v1905_v16  ;;  %v4721_v59 = vrot.slane %v3900_v48, 4 }
  0x53   : > { %3198 = vmatprep.mubr.msk.f32.mxu0 %vm352_vm3, %v4011_v8  ;;  %4719 = vst [vmem:[#allocation15_spill] sm:$0xff] %v4222_v7  ;;  %v4225_v62 = vsel %vm1875_vm6, %v1905_v16, %v1907_v14  ;;  %v4722_v35 = vrot.slane %v3897_v47, 4  ;;  %v4236_v10 = vsel %vm744_vm5, %v780_v46, %v998_v21  ;;  %v4724_v1 = vrot.slane %v4194_v61, 5 }
  0x54   : > { %4720 = vst [vmem:[#allocation16_spill] sm:$0xff] %v4225_v62  ;;  %4723 = vst [vmem:[#allocation17_spill] sm:$0xff] %v4236_v10  ;;  %v4246_v16 = vsel %vm744_vm5, %v998_v21, %v1000_v63  ;;  %v2128_v62 = vrot.slane %v3826_v13, 6  ;;  %v1461_v46 = vrot.slane %v3915_v56, 4  ;;  %v2137_v21 = vrot.slane %v3858_v32, 6 }
  0x55   : > { %v4233_v43 = vsel %vm389_vm1, %v4722_v35, %v4721_v59  ;;  %v4241_v0 = vsel %vm1875_vm6, %v1907_v14, %v4724_v1  ;;  %3083 = vmatmul.mubr.msk.f32.gmra.mrb[4].mxu1 %vm352_vm3, %v3832_v17  ;;  %4726 = vst [vmem:[#allocation19_spill] sm:$0xff] %v4246_v16  ;;  %v2129_v35 = vrot.slane %v3832_v17, 6  ;;  %v2131_v59 = vrot.slane %v3836_v19, 6 }
  0x56   : > { %4725 = vst [vmem:[#allocation18_spill] sm:$0xff] %v4241_v0  ;;  %3199 = vmatmul.mubr.msk.f32.gmra.mrb[4].mxu0 %vm352_vm3, %v4017_v15  ;;  %3085 = vmatprep.mubr.msk.f32.mxu1 %vm352_vm3, %v3836_v19  ;;  %v2133_v14 = vrot.slane %v3843_v24, 6  ;;  %v2135_v1 = vrot.slane %v3850_v28, 6  ;;  %v2139_v63 = vrot.slane %v3878_v42, 6  ;;  %v2141_v19 = vrot.slane %v3888_v44, 6 }
  0x57   : > { %3201 = vmatprep.mubr.msk.f32.mxu0 %vm352_vm3, %v4024_v23  ;;  %v4262_v13 = vsel %vm2127_vm7, %v2128_v62, %v2129_v35  ;;  %v4265_v17 = vsel %vm2127_vm7, %v2129_v35, %v2131_v59  ;;  %v2143_v7 = vrot.slane %v3897_v47, 6 }
  0x58   : > { %v4270_v16 = vsel %vm2127_vm7, %v2131_v59, %v2133_v14  ;;  %v4273_v0 = vsel %vm2127_vm7, %v2133_v14, %v2135_v1  ;;  %v4276_v10 = vsel %vm2127_vm7, %v2135_v1, %v2137_v21  ;;  %v4282_v62 = vsel %vm2127_vm7, %v2137_v21, %v2139_v63 }
  0x59   : > { %4727 = vst [vmem:[#allocation20_spill] sm:$0xff] %v4270_v16  ;;  %4728 = vst [vmem:[#allocation21_spill] sm:$0xff] %v4273_v0  ;;  %3086 = vmatmul.mubr.msk.f32.gmra.mrb[6].mxu1 %vm352_vm3, %v3843_v24  ;;  %v4285_v35 = vsel %vm2127_vm7, %v2139_v63, %v2141_v19  ;;  %v2145_v59 = vrot.slane %v3900_v48, 6  ;;  %v2147_v14 = vrot.slane %v3908_v53, 6  ;;  %v4294_v1 = vsel %vm2127_vm7, %v2141_v19, %v2143_v7 }
  0x5a   : > { %4729 = vst [vmem:[#allocation22_spill] sm:$0xff] %v4276_v10  ;;  %4730 = vst [vmem:[#allocation23_spill] sm:$0xff] %v4282_v62  ;;  %3202 = vmatmul.mubr.msk.f32.gmra.mrb[6].mxu0 %vm352_vm3, %v4096_v33  ;;  %3088 = vmatprep.mubr.msk.f32.mxu1 %vm352_vm3, %v3850_v28  ;;  %v2149_v24 = vrot.slane %v3915_v56, 6  ;;  %v2151_v21 = vrot.slane %v3933_v4, 6  ;;  %v2153_v63 = vrot.slane %v3938_v11, 6  ;;  %v2155_v28 = vrot.slane %v3946_v18, 6 }
  0x5b   : > { %4731 = vst [vmem:[#allocation24_spill] sm:$0xff] %v4285_v35  ;;  %4732 = vst [vmem:[#allocation25_spill] sm:$0xff] %v4294_v1  ;;  %3204 = vmatprep.mubr.msk.f32.mxu0 %vm352_vm3, %v4099_v34  ;;  %v4302_v35 = vsel %vm2127_vm7, %v2143_v7, %v2145_v59  ;;  %v4305_v62 = vsel %vm2127_vm7, %v2145_v59, %v2147_v14  ;;  %v2157_v19 = vrot.slane %v3949_v20, 6  ;;  %v4310_v1 = vld [vmem:[%s3801_s18 + $0xb0] sm:$0xff]  ;;  %v2159_v7 = vrot.slane %v3958_v26, 6 }
  0x5c   : > { %4733 = vst [vmem:[#allocation26_spill] sm:$0xff] %v4305_v62  ;;  %v4313_v10 = vsel %vm2127_vm7, %v2147_v14, %v2149_v24  ;;  %v4316_v0 = vsel %vm2127_vm7, %v2149_v24, %v2151_v21  ;;  %v4319_v16 = vsel %vm2127_vm7, %v2151_v21, %v2153_v63  ;;  %v4325_v59 = vsel %vm2127_vm7, %v2153_v63, %v2155_v28 }
  0x5d   : > { %4734 = vst [vmem:[#allocation27_spill] sm:$0xff] %v4313_v10  ;;  %3089 = vmatmul.mubr.msk.f32.gmra.mrb[8].mxu1 %vm352_vm3, %v3858_v32  ;;  %4735 = vst [vmem:[#allocation28_spill] sm:$0xff] %v4325_v59  ;;  %v4328_v62 = vsel %vm2127_vm7, %v2155_v28, %v2157_v19  ;;  %v2161_v14 = vrot.slane %v4194_v61, 6  ;;  %v2163_v10 = vrot.slane %v4310_v1, 6  ;;  %v4337_v24 = vsel %vm2127_vm7, %v2157_v19, %v2159_v7 }
  0x5e   : > { %4736 = vst [vmem:[#allocation29_spill] sm:$0xff] %v4328_v62  ;;  %3205 = vmatmul.mubr.msk.f32.gmra.mrb[8].mxu0 %vm352_vm3, %v4120_v51  ;;  %3091 = vmatprep.mubr.msk.f32.mxu1 %vm352_vm3, %v3878_v42  ;;  %4737 = vst [vmem:[#allocation30_spill] sm:$0xff] %v4337_v24  ;;  %v4738_v32 = vrot.slane %v3908_v53, 4  ;;  %v4739_v21 = vrot.slane %v3900_v48, 4  ;;  %v1463_v28 = vrot.slane %v3933_v4, 4  ;;  %v1465_v24 = vrot.slane %v3938_v11, 4 }
  0x5f   : > { %3207 = vmatprep.mubr.msk.f32.mxu0 %vm352_vm3, %v4233_v43  ;;  %v4348_v62 = vsel %vm2127_vm7, %v2159_v7, %v2161_v14  ;;  %v4351_v59 = vsel %vm2127_vm7, %v2161_v14, %v2163_v10  ;;  %v1467_v10 = vrot.slane %v3946_v18, 4 }
  0x60   : > { %v1460_v63 = vsel %vm389_vm1, %v4739_v21, %v4738_v32  ;;  %v4740_v42 = vmov %v4738_v32  ;;  %v1464_v7 = vsel %vm389_vm1, %v1461_v46, %v1463_v28  ;;  %v1466_v14 = vsel %vm389_vm1, %v1463_v28, %v1465_v24 }
  0x61   : > { %v1462_v19 = vsel %vm389_vm1, %v4740_v42, %v1461_v46  ;;  %3092 = vmatmul.mubr.msk.f32.gmra.mrb[10].mxu1 %vm352_vm3, %v3888_v44  ;;  %v1469_v32 = vrot.slane %v3949_v20, 4  ;;  %v1468_v44 = vsel %vm389_vm1, %v1465_v24, %v1467_v10 }
  0x62   : > { %3208 = vmatmul.mubr.msk.f32.gmra.mrb[10].mxu0 %vm352_vm3, %v1460_v63  ;;  %3094 = vmatprep.mubr.msk.f32.mxu1 %vm352_vm3, %v3897_v47  ;;  %v1471_v47 = vrot.slane %v3958_v26, 4  ;;  %v4741_v26 = vld [vmem:[#allocation6_spill] sm:$0xff] }
  0x63   : > { %3210 = vmatprep.mubr.msk.f32.mxu0 %vm352_vm3, %v1462_v19  ;;  %v1470_v18 = vsel %vm389_vm1, %v1467_v10, %v1469_v32 }
  0x65   : > { %3095 = vmatmul.mubr.msk.f32.gmra.mrb[12].mxu1 %vm352_vm3, %v3900_v48  ;;  %v1472_v48 = vsel %vm389_vm1, %v1469_v32, %v1471_v47 }
  0x66   : > { %3211 = vmatmul.mubr.msk.f32.gmra.mrb[12].mxu0 %vm352_vm3, %v1464_v7  ;;  %3097 = vmatprep.mubr.msk.f32.mxu1 %vm352_vm3, %v3908_v53  ;;  %v2842_v53 = vld [vmem:[%s4701_s1 + $0x20] sm:$0xf] }
  0x67   : > { %3213 = vmatprep.mubr.msk.f32.mxu0 %vm352_vm3, %v1466_v14 }
  0x69   : > { %3098 = vmatmul.mubr.msk.f32.gmra.mrb[14].mxu1 %vm352_vm3, %v3915_v56  ;;  %v1689_v56 = vrot.slane %v4194_v61, 4 }
  0x6a   : > { %3214 = vmatmul.mubr.msk.f32.gmra.mrb[14].mxu0 %vm352_vm3, %v1468_v44  ;;  %3100 = vmatprep.mubr.msk.f32.mxu1 %vm352_vm3, %v3933_v4  ;;  %v1691_v4 = vrot.slane %v4310_v1, 4 }
  0x6b   : > { %3216 = vmatprep.mubr.msk.f32.mxu0 %vm352_vm3, %v1470_v18 }
  0x6c   : > { %v1692_v20 = vsel %vm389_vm1, %v1689_v56, %v1691_v4 }
  0x6d   : > { %3101 = vmatmul.mubr.msk.f32.gmra.mrb[16].mxu1 %vm352_vm3, %v3938_v11  ;;  %v1690_v11 = vsel %vm389_vm1, %v1471_v47, %v1689_v56 }
  0x6e   : > { %3217 = vmatmul.mubr.msk.f32.gmra.mrb[16].mxu0 %vm352_vm3, %v1472_v48  ;;  %3105 = vmatprep.mubr.msk.f32.mxu1 %vm352_vm3, %v4032_v30  ;;  %v4747_v30 = vld [vmem:[#allocation12_spill] sm:$0xff] }
  0x6f   : > { %3221 = vmatprep.mubr.msk.f32.mxu0 %vm352_vm3, %v4004_v2  ;;  %v4742_v2 = vld [vmem:[#allocation7_spill] sm:$0xff] }
  0x71   : > { %3106 = vmatmul.mubr.msk.f32.vlgmr.msra.gmra.mrb[0].mxu1 %vm352_vm3, %v4039_v36  ;;  %v4748_v36 = vld [vmem:[#allocation13_spill] sm:$0xff] }
  0x72   : > { %3222 = vmatmul.mubr.msk.f32.vlgmr.msra.gmra.mrb[0].mxu0 %vm352_vm3, %v4007_v3  ;;  %3108 = vmatprep.mubr.msk.f32.mxu1 %vm352_vm3, %v4042_v37  ;;  %v4743_v3 = vld [vmem:[#allocation8_spill] sm:$0xff] }
  0x73   : > { %3249 = vmatpush3.msk.msra.mxu0 %vm389_vm1, %v4140_v12  ;;  %3224 = vmatprep.mubr.msk.f32.mxu0 %vm352_vm3, %v4011_v8  ;;  %v4744_v8 = vld [vmem:[#allocation9_spill] sm:$0xff]  ;;  %v2423_v12 = vlaneseq }
  0x74   : > { %3133 = vmatpush3.msk.msra.mxu1 %vm389_vm1, %v4155_v6  ;;  %3277 = vmatprep.subr.msk.mxu0 %vm389_vm1, %v2842_v53 }
  0x75   : > { %3109 = vmatmul.mubr.msk.f32.gmra.mrb[2].mxu1 %vm352_vm3, %v4045_v38 }
  0x76   : > { %3225 = vmatmul.mubr.msk.f32.gmra.mrb[2].mxu0 %vm352_vm3, %v4017_v15  ;;  %3111 = vmatprep.mubr.msk.f32.mxu1 %vm352_vm3, %v4049_v40  ;;  %v4745_v15 = vld [vmem:[#allocation10_spill] sm:$0xff] }
  0x77   : > { %3227 = vmatprep.mubr.msk.f32.mxu0 %vm352_vm3, %v4024_v23  ;;  %v4746_v23 = vld [vmem:[#allocation11_spill] sm:$0xff] }
  0x79   : > { %3112 = vmatmul.mubr.msk.f32.gmra.mrb[4].mxu1 %vm352_vm3, %v4052_v41 }
  0x7a   : > { %3228 = vmatmul.mubr.msk.f32.gmra.mrb[4].mxu0 %vm352_vm3, %v4096_v33  ;;  %3114 = vmatprep.mubr.msk.f32.mxu1 %vm352_vm3, %v4055_v45  ;;  %v4760_v33 = vld [vmem:[#allocation24_spill] sm:$0xff] }
  0x7b   : > { %3230 = vmatprep.mubr.msk.f32.mxu0 %vm352_vm3, %v4099_v34  ;;  %v4761_v34 = vld [vmem:[#allocation25_spill] sm:$0xff] }
  0x7d   : > { %3115 = vmatmul.mubr.msk.f32.gmra.mrb[6].mxu1 %vm352_vm3, %v4060_v49 }
  0x7e   : > { %3231 = vmatmul.mubr.msk.f32.gmra.mrb[6].mxu0 %vm352_vm3, %v4120_v51  ;;  %3117 = vmatprep.mubr.msk.f32.mxu1 %vm352_vm3, %v4068_v55  ;;  %v4764_v51 = vld [vmem:[#allocation28_spill] sm:$0xff] }
  0x7f   : > { %3233 = vmatprep.mubr.msk.f32.mxu0 %vm352_vm3, %v4233_v43 }
  0x81   : > { %3118 = vmatmul.mubr.msk.f32.gmra.mrb[8].mxu1 %vm352_vm3, %v4075_v22 }
  0x82   : > { %3234 = vmatmul.mubr.msk.f32.gmra.mrb[8].mxu0 %vm352_vm3, %v1460_v63  ;;  %3120 = vmatprep.mubr.msk.f32.mxu1 %vm352_vm3, %v4078_v25 }
  0x83   : > { %3236 = vmatprep.mubr.msk.f32.mxu0 %vm352_vm3, %v1462_v19 }
  0x85   : > { %3121 = vmatmul.mubr.msk.f32.gmra.mrb[10].mxu1 %vm352_vm3, %v4081_v57 }
  0x86   : > { %3237 = vmatmul.mubr.msk.f32.gmra.mrb[10].mxu0 %vm352_vm3, %v1464_v7  ;;  %3123 = vmatprep.mubr.msk.f32.mxu1 %vm352_vm3, %v4085_v27 }
  0x87   : > { %3239 = vmatprep.mubr.msk.f32.mxu0 %vm352_vm3, %v1466_v14 }
  0x89   : > { %3124 = vmatmul.mubr.msk.f32.gmra.mrb[12].mxu1 %vm352_vm3, %v4088_v29 }
  0x8a   : > { %3240 = vmatmul.mubr.msk.f32.gmra.mrb[12].mxu0 %vm352_vm3, %v1468_v44  ;;  %3126 = vmatprep.mubr.msk.f32.mxu1 %vm352_vm3, %v4091_v31  ;;  %v4594_v44 = vld [vmem:[%s4702_s2] ss:$0 sm:$0xff] }
  0x8b   : > { %3242 = vmatprep.mubr.msk.f32.mxu0 %vm352_vm3, %v1470_v18 }
  0x8d   : > { %3127 = vmatmul.mubr.msk.f32.gmra.mrb[14].mxu1 %vm352_vm3, %v4102_v39 }
  0x8e   : > { %3243 = vmatmul.mubr.msk.f32.gmra.mrb[14].mxu0 %vm352_vm3, %v1472_v48  ;;  %3129 = vmatprep.mubr.msk.f32.mxu1 %vm352_vm3, %v4110_v50 }
  0x8f   : > { %3245 = vmatprep.mubr.msk.f32.mxu0 %vm352_vm3, %v1690_v11 }
  0x91   : > { %3130 = vmatmul.mubr.msk.f32.gmra.mrb[16].mxu1 %vm352_vm3, %v4124_v5 }
  0x92   : > { %3246 = vmatmul.mubr.msk.f32.gmra.mrb[16].mxu0 %vm352_vm3, %v1692_v20  ;;  %3134 = vmatprep.mubr.msk.f32.mxu1 %vm352_vm3, %v4042_v37  ;;  %v4749_v37 = vld [vmem:[#allocation14_spill] sm:$0xff] }
  0x93   : > { %3250 = vmatprep.mubr.msk.f32.mxu0 %vm352_vm3, %v4128_v60  ;;  %v4766_v60 = vld [vmem:[#allocation30_spill] sm:$0xff] }
  0x95   : > { %3135 = vmatmul.mubr.msk.f32.vlgmr.msra.gmra.mrb[0].mxu1 %vm352_vm3, %v4045_v38  ;;  %v4750_v38 = vld [vmem:[#allocation15_spill] sm:$0xff] }
  0x96   : > { %3251 = vmatmul.mubr.msk.f32.vlgmr.msra.gmra.mrb[0].mxu0 %vm352_vm3, %v4131_v54  ;;  %3137 = vmatprep.mubr.msk.f32.mxu1 %vm352_vm3, %v4049_v40  ;;  %v1911_v40 = vrot.slane %v4310_v1, 5  ;;  %v3668_v54 = vmov 0.0|0.0  }
  0x97   : > { %3278 = vmatpush3.msk.msra.mxu0 %vm389_vm1, %v2842_v53  ;;  %3253 = vmatprep.mubr.msk.f32.mxu0 %vm352_vm3, %v4143_v58  ;;  %v2424_v58 = vshrl.u32 %v2423_v12, 7 }
  0x98   : > { %3317 = vmatprep.subr.bf16.mxu1 %v3668_v54 }
  0x99   : > { %3138 = vmatmul.mubr.msk.f32.gmra.mrb[2].mxu1 %vm352_vm3, %v4052_v41  ;;  %v4751_v41 = vld [vmem:[#allocation16_spill] sm:$0xff]  ;;  %v2429_v6 = vsub.s32 1, %v2424_v58 }
  0x9a   : > { %3254 = vmatmul.mubr.msk.f32.gmra.mrb[2].mxu0 %vm352_vm3, %v4158_v9  ;;  %3140 = vmatprep.mubr.msk.f32.mxu1 %vm352_vm3, %v4055_v45  ;;  %v4752_v45 = vld [vmem:[#allocation17_spill] sm:$0xff] }
  0x9b   : > { %3256 = vmatprep.mubr.msk.f32.mxu0 %vm352_vm3, %v4741_v26  ;;  %v2421_v9 = vld [vmem:[%s4703_s3] sm:$0x3] }
  0x9d   : > { %3141 = vmatmul.mubr.msk.f32.gmra.mrb[4].mxu1 %vm352_vm3, %v4060_v49  ;;  %v4753_v49 = vld [vmem:[#allocation18_spill] sm:$0xff] }
  0x9e   : > { %3257 = vmatmul.mubr.msk.f32.gmra.mrb[4].mxu0 %vm352_vm3, %v4742_v2  ;;  %3143 = vmatprep.mubr.msk.f32.mxu1 %vm352_vm3, %v4068_v55  ;;  %v4754_v55 = vrot.slane %v4194_v61, 5  ;;  %v2430_v61 = vrot.slane %v2421_v9, %v2429_v6 }
  0x9f   : > { %3259 = vmatprep.mubr.msk.f32.mxu0 %vm352_vm3, %v4743_v3 }
  0xa1   : > { %3144 = vmatmul.mubr.msk.f32.gmra.mrb[6].mxu1 %vm352_vm3, %v4075_v22  ;;  %v1912_v22 = vsel %vm1875_vm6, %v4754_v55, %v1911_v40 }
  0xa2   : > { %3260 = vmatmul.mubr.msk.f32.gmra.mrb[6].mxu0 %vm352_vm3, %v4744_v8  ;;  %3146 = vmatprep.mubr.msk.f32.mxu1 %vm352_vm3, %v4078_v25  ;;  %v4755_v25 = vld [vmem:[#allocation19_spill] sm:$0xff] }
  0xa3   : > { %3262 = vmatprep.mubr.msk.f32.mxu0 %vm352_vm3, %v4745_v15 }
  0xa5   : > { %3147 = vmatmul.mubr.msk.f32.gmra.mrb[8].mxu1 %vm352_vm3, %v4081_v57  ;;  %v4756_v57 = vld [vmem:[#allocation20_spill] sm:$0xff] }
  0xa6   : > { %3263 = vmatmul.mubr.msk.f32.gmra.mrb[8].mxu0 %vm352_vm3, %v4746_v23  ;;  %3149 = vmatprep.mubr.msk.f32.mxu1 %vm352_vm3, %v4085_v27  ;;  %v4757_v27 = vld [vmem:[#allocation21_spill] sm:$0xff] }
  0xa7   : > { %3265 = vmatprep.mubr.msk.f32.mxu0 %vm352_vm3, %v4747_v30 }
  0xa9   : > { %3150 = vmatmul.mubr.msk.f32.gmra.mrb[10].mxu1 %vm352_vm3, %v4088_v29  ;;  %v4758_v29 = vld [vmem:[#allocation22_spill] sm:$0xff] }
  0xaa   : > { %3266 = vmatmul.mubr.msk.f32.gmra.mrb[10].mxu0 %vm352_vm3, %v4748_v36  ;;  %3152 = vmatprep.mubr.msk.f32.mxu1 %vm352_vm3, %v4091_v31  ;;  %v4759_v31 = vld [vmem:[#allocation23_spill] sm:$0xff] }
  0xab   : > { %3268 = vmatprep.mubr.msk.f32.mxu0 %vm352_vm3, %v4749_v37 }
  0xad   : > { %3153 = vmatmul.mubr.msk.f32.gmra.mrb[12].mxu1 %vm352_vm3, %v4102_v39  ;;  %v4762_v39 = vld [vmem:[#allocation26_spill] sm:$0xff] }
  0xae   : > { %3269 = vmatmul.mubr.msk.f32.gmra.mrb[12].mxu0 %vm352_vm3, %v4219_v52  ;;  %3155 = vmatprep.mubr.msk.f32.mxu1 %vm352_vm3, %v4110_v50  ;;  %v4763_v50 = vld [vmem:[#allocation27_spill] sm:$0xff]  ;;  %v2425_v52 = vsub.s32 0, %v2424_v58 }
  0xaf   : > { %3271 = vmatprep.mubr.msk.f32.mxu0 %vm352_vm3, %v4750_v38 }
  0xb0   : > { %v4577_v43 = vrot.slane %v2421_v9, %v2425_v52 }
  0xb1   : > { %3156 = vmatmul.mubr.msk.f32.gmra.mrb[14].mxu1 %vm352_vm3, %v4124_v5  ;;  %v4765_v5 = vld [vmem:[#allocation29_spill] sm:$0xff] }
  0xb2   : > { %3272 = vmatmul.mubr.msk.f32.gmra.mrb[14].mxu0 %vm352_vm3, %v4751_v41  ;;  %3158 = vmatprep.mubr.msk.f32.mxu1 %vm352_vm3, %v4752_v45 }
  0xb3   : > { %3274 = vmatprep.mubr.msk.f32.mxu0 %vm352_vm3, %v4753_v49 }
  0xb5   : > { %3159 = vmatmul.mubr.msk.f32.gmra.mrb[16].mxu1 %vm352_vm3, %v4755_v25 }
  0xb6   : > { %3275 = vmatmul.mubr.msk.f32.gmra.mrb[16].mxu0 %vm352_vm3, %v1912_v22  ;;  %2863 = vmatprep.mubr.msk.f32.mxu1 %vm2432_vm8, %v2430_v61 }
  0xb7   : > { %3279 = vmatprep.mubr.msk.f32.mxu0 %vm352_vm3, %v4262_v13 }
  0xba   : > { %3280 = vmatmul.mubr.msk.f32.vlgmr.msra.gmra.mrb[0].mxu0 %vm352_vm3, %v4265_v17 }
  0xbb   : > { %3282 = vmatprep.mubr.msk.f32.mxu0 %vm352_vm3, %v4756_v57 }
  0xbe   : > { %3283 = vmatmul.mubr.msk.f32.gmra.mrb[2].mxu0 %vm352_vm3, %v4757_v27 }
  0xbf   : > { %3285 = vmatprep.mubr.msk.f32.mxu0 %vm352_vm3, %v4758_v29 }
  0xc2   : > { %3286 = vmatmul.mubr.msk.f32.gmra.mrb[4].mxu0 %vm352_vm3, %v4759_v31 }
  0xc3   : > { %3288 = vmatprep.mubr.msk.f32.mxu0 %vm352_vm3, %v4760_v33 }
  0xc6   : > { %3289 = vmatmul.mubr.msk.f32.gmra.mrb[6].mxu0 %vm352_vm3, %v4761_v34 }
  0xc7   : > { %3291 = vmatprep.mubr.msk.f32.mxu0 %vm352_vm3, %v4302_v35 }
  0xca   : > { %3292 = vmatmul.mubr.msk.f32.gmra.mrb[8].mxu0 %vm352_vm3, %v4762_v39 }
  0xcb   : > { %3294 = vmatprep.mubr.msk.f32.mxu0 %vm352_vm3, %v4763_v50 }
  0xce   : > { %3295 = vmatmul.mubr.msk.f32.gmra.mrb[10].mxu0 %vm352_vm3, %v4316_v0 }
  0xcf   : > { %3297 = vmatprep.mubr.msk.f32.mxu0 %vm352_vm3, %v4319_v16 }
  0xd2   : > { %3298 = vmatmul.mubr.msk.f32.gmra.mrb[12].mxu0 %vm352_vm3, %v4764_v51 }
  0xd3   : > { %3300 = vmatprep.mubr.msk.f32.mxu0 %vm352_vm3, %v4765_v5 }
  0xd6   : > { %3301 = vmatmul.mubr.msk.f32.gmra.mrb[14].mxu0 %vm352_vm3, %v4766_v60 }
  0xd7   : > { %3303 = vmatprep.mubr.msk.f32.mxu0 %vm352_vm3, %v4348_v62 }
  0xda   : > { %3304 = vmatmul.mubr.msk.f32.gmra.mrb[16].mxu0 %vm352_vm3, %v4351_v59 }
 0x168   : > { %v3136_v0 = vpop.f32.mrb[0].mxu1 }
 0x169   : > { %v1075_v16 = vpop.f32.mrb[1].mxu1 }
 0x16c   : > { %v3139_v46 = vpop.f32.mrb[2].mxu1 }
 0x16d   : > { %v1085_v13 = vpop.f32.mrb[3].mxu1 }
 0x170   : > { %v3142_v17 = vpop.f32.mrb[4].mxu1 }
 0x171   : > { %v1095_v62 = vpop.f32.mrb[5].mxu1 }
 0x174   : > { %v3145_v35 = vpop.f32.mrb[6].mxu1 }
 0x175   : > { %v1105_v1 = vpop.f32.mrb[7].mxu1 }
 0x178   : > { %v3148_v59 = vpop.f32.mrb[8].mxu1 }
 0x179   : > { %v1115_v24 = vpop.f32.mrb[9].mxu1 }
 0x17c   : > { %v3151_v21 = vpop.f32.mrb[10].mxu1 }
 0x17d   : > { %v1125_v63 = vpop.f32.mrb[11].mxu1 }
 0x180   : > { %v4579_v28 = vpop.f32.mrb[12].mxu1 }
 0x181   : > { %v4581_v42 = vpop.f32.mrb[13].mxu1 }
 0x184   : > { %v4583_v19 = vpop.f32.mrb[14].mxu1 }
 0x185   : > { %v4585_v7 = vpop.f32.mrb[15].mxu1 }
 0x188   : > { %v4587_v10 = vpop.f32.mrb[16].mxu1 }
 0x189   : > { %v4589_v14 = vpop.f32.mrb[17].mxu1 }
 0x18d   : > { %v3281_v32 = vpop.f32.mrb[0].mxu0 }
 0x18e   : > { %v3350_v47 = vadd.f32 %v3281_v32, %v3136_v0  ;;  %v2270_v18 = vpop.f32.mrb[1].mxu0 }
 0x18f   : > { %v3351_v48 = vadd.f32 %v2270_v18, %v1075_v16 }
 0x190   : > { %v2385_v53 = vadd.f32 %v3350_v47, %v4594_v44 }
 0x191   : > { %v2384_v56 = vadd.f32 %v3351_v48, %v4594_v44  ;;  %v3284_v4 = vpop.f32.mrb[2].mxu0 }
 0x192   : > { %v2403_v11 = vmax.f32 %v2385_v53, 0.0  ;;  %v3352_v20 = vadd.f32 %v3284_v4, %v3139_v46  ;;  %v2280_v26 = vpop.f32.mrb[3].mxu0 }
 0x193   : > { %v2402_v2 = vmax.f32 %v2384_v56, 0.0  ;;  %v3353_v3 = vadd.f32 %v2280_v26, %v1085_v13 }
 0x194   : > { %v2387_v8 = vadd.f32 %v3352_v20, %v4594_v44 }
 0x195   : > { %v3318_v15 = vpack.c.bf16 %v2403_v11, %v2402_v2  ;;  %v2386_v23 = vadd.f32 %v3353_v3, %v4594_v44  ;;  %v3287_v30 = vpop.f32.mrb[4].mxu0 }
 0x196   : > { %v2405_v36 = vmax.f32 %v2387_v8, 0.0  ;;  %v3354_v37 = vadd.f32 %v3287_v30, %v3142_v17  ;;  %v2290_v38 = vpop.f32.mrb[5].mxu0 }
 0x197   : > { %v2404_v40 = vmax.f32 %v2386_v23, 0.0  ;;  %v3355_v41 = vadd.f32 %v2290_v38, %v1095_v62  ;;  %3319 = vmatpush1.bf16.msra.mxu1 %v3318_v15 }
 0x198   : > { %v2389_v45 = vadd.f32 %v3354_v37, %v4594_v44  ;;  %3320 = vmatprep.subr.bf16.mxu1 %v3668_v54 }
 0x199   : > { %v3321_v49 = vpack.c.bf16 %v2405_v36, %v2404_v40  ;;  %v2388_v55 = vadd.f32 %v3355_v41, %v4594_v44  ;;  %v3290_v22 = vpop.f32.mrb[6].mxu0 }
 0x19a   : > { %v2407_v25 = vmax.f32 %v2389_v45, 0.0  ;;  %v3356_v57 = vadd.f32 %v3290_v22, %v3145_v35  ;;  %v2300_v27 = vpop.f32.mrb[7].mxu0  ;;  %v3669_v22 = vmov (!%p2864_p0), 0.0|0.0  }
 0x19b   : > { %v2406_v29 = vmax.f32 %v2388_v55, 0.0  ;;  %v3357_v31 = vadd.f32 %v2300_v27, %v1105_v1  ;;  %3322 = vmatpush1.bf16.msra.mxu1 %v3321_v49  ;;  %3344 = vmatprep.subr.bf16.mxu0 (!%p2864_p0), %v3669_v22  ;;  %v3671_v27 = vmov (!%p2864_p0), 0.0  }
 0x19c   : > { %v2391_v33 = vadd.f32 %v3356_v57, %v4594_v44  ;;  %3323 = vmatprep.subr.bf16.mxu1 %v3668_v54  ;;  %v2517_v57 = vld [vmem:[%s4704_s4 + $0x18] sm:$0xff] (!%p2864_p0)  ;;  %3314 = vmatprep.mubr.msk.f32.mxu0 (!%p2864_p0), %vm3670_vm10, %v3671_v27 }
 0x19d   : > { %v3324_v34 = vpack.c.bf16 %v2407_v25, %v2406_v29  ;;  %v2390_v39 = vadd.f32 %v3357_v31, %v4594_v44  ;;  %v3293_v50 = vpop.f32.mrb[8].mxu0 }
 0x19e   : > { %v2409_v51 = vmax.f32 %v2391_v33, 0.0  ;;  %v3358_v5 = vadd.f32 %v3293_v50, %v3148_v59  ;;  %v2310_v60 = vpop.f32.mrb[9].mxu0 }
 0x19f   : > { %v2408_v12 = vmax.f32 %v2390_v39, 0.0  ;;  %v3359_v58 = vadd.f32 %v2310_v60, %v1115_v24  ;;  %3325 = vmatpush1.bf16.msra.mxu1 %v3324_v34  ;;  %v2518_v34 = vld [vmem:[%s4705_s5] sm:$0x1] (!%p2864_p0) }
 0x1a0   : > { %v2393_v6 = vadd.f32 %v3358_v5, %v4594_v44  ;;  %3326 = vmatprep.subr.bf16.mxu1 %v3668_v54 }
 0x1a1   : > { %v3327_v9 = vpack.c.bf16 %v2409_v51, %v2408_v12  ;;  %v2392_v52 = vadd.f32 %v3359_v58, %v4594_v44  ;;  %v3296_v61 = vpop.f32.mrb[10].mxu0 }
 0x1a2   : > { %v2411_v0 = vmax.f32 %v2393_v6, 0.0  ;;  %v3360_v16 = vadd.f32 %v3296_v61, %v3151_v21  ;;  %v2320_v46 = vpop.f32.mrb[11].mxu0 }
 0x1a3   : > { %v2410_v13 = vmax.f32 %v2392_v52, 0.0  ;;  %v3361_v17 = vadd.f32 %v2320_v46, %v1125_v63  ;;  %3328 = vmatpush1.bf16.msra.mxu1 %v3327_v9 }
 0x1a4   : > { %v2395_v62 = vadd.f32 %v3360_v16, %v4594_v44  ;;  %3329 = vmatprep.subr.bf16.mxu1 %v3668_v54 }
 0x1a5   : > { %v3330_v35 = vpack.c.bf16 %v2411_v0, %v2410_v13  ;;  %v2394_v1 = vadd.f32 %v3361_v17, %v4594_v44  ;;  %v3299_v59 = vpop.f32.mrb[12].mxu0 }
 0x1a6   : > { %v2413_v24 = vmax.f32 %v2395_v62, 0.0  ;;  %v3362_v32 = vadd.f32 %v3299_v59, %v4579_v28  ;;  %v2330_v47 = vpop.f32.mrb[13].mxu0 }
 0x1a7   : > { %v2412_v18 = vmax.f32 %v2394_v1, 0.0  ;;  %v3363_v48 = vadd.f32 %v2330_v47, %v4581_v42  ;;  %3331 = vmatpush1.bf16.msra.mxu1 %v3330_v35 }
 0x1a8   : > { %v2397_v21 = vadd.f32 %v3362_v32, %v4594_v44  ;;  %3332 = vmatprep.subr.bf16.mxu1 %v3668_v54 }
 0x1a9   : > { %v3333_v63 = vpack.c.bf16 %v2413_v24, %v2412_v18  ;;  %v2396_v53 = vadd.f32 %v3363_v48, %v4594_v44  ;;  %v3302_v56 = vpop.f32.mrb[14].mxu0 }
 0x1aa   : > { %v2415_v4 = vmax.f32 %v2397_v21, 0.0  ;;  %v3364_v11 = vadd.f32 %v3302_v56, %v4583_v19  ;;  %v2340_v20 = vpop.f32.mrb[15].mxu0 }
 0x1ab   : > { %v2414_v26 = vmax.f32 %v2396_v53, 0.0  ;;  %v3365_v28 = vadd.f32 %v2340_v20, %v4585_v7  ;;  %3334 = vmatpush1.bf16.msra.mxu1 %v3333_v63 }
 0x1ac   : > { %v2399_v2 = vadd.f32 %v3364_v11, %v4594_v44  ;;  %3335 = vmatprep.subr.bf16.mxu1 %v3668_v54 }
 0x1ad   : > { %v3336_v42 = vpack.c.bf16 %v2415_v4, %v2414_v26  ;;  %v2398_v3 = vadd.f32 %v3365_v28, %v4594_v44  ;;  %v3305_v8 = vpop.f32.mrb[16].mxu0 }
 0x1ae   : > { %v2417_v15 = vmax.f32 %v2399_v2, 0.0  ;;  %v3366_v23 = vadd.f32 %v3305_v8, %v4587_v10  ;;  %v2350_v30 = vpop.f32.mrb[17].mxu0  ;;  %v2420_v10 = vld [vmem:[#allocation2] sm:$0x1] }
 0x1af   : > { %v2416_v36 = vmax.f32 %v2398_v3, 0.0  ;;  %v3367_v19 = vadd.f32 %v2350_v30, %v4589_v14  ;;  %3337 = vmatpush1.bf16.msra.mxu1 %v3336_v42 }
 0x1b0   : > { %v2401_v37 = vadd.f32 %v3366_v23, %v4594_v44  ;;  %3338 = vmatprep.subr.bf16.mxu1 %v3668_v54 }
 0x1b1   : > { %v3339_v7 = vpack.c.bf16 %v2417_v15, %v2416_v36  ;;  %v2400_v38 = vadd.f32 %v3367_v19, %v4594_v44  ;;  %v2514_v44 = vld [vmem:[%s4704_s4] sm:$0xff] (!%p2864_p0) }
 0x1b2   : > { %v2419_v40 = vmax.f32 %v2401_v37, 0.0 }
 0x1b3   : > { %v2418_v41 = vmax.f32 %v2400_v38, 0.0  ;;  %3340 = vmatpush1.bf16.msra.mxu1 %v3339_v7 }
 0x1b4   : > { %3341 = vmatprep.subr.bf16.mxu1 %v3668_v54  ;;  %v2515_v54 = vld [vmem:[%s4704_s4 + $0x8] sm:$0xff] (!%p2864_p0) }
 0x1b5   : > { %v3342_v45 = vpack.c.bf16 %v2419_v40, %v2418_v41  ;;  %v3345_v25 = vpack.c.bf16 (!%p2864_p0), %v2515_v54, %v2514_v44 }
 0x1b7   : > { %3343 = vmatpush1.bf16.msra.mxu1 %v3342_v45  ;;  %3346 = vmatpush3.bf16.msra.mxu0 (!%p2864_p0), %v3345_v25 }
 0x1b8   : > { %3347 = vmatprep.subr.bf16.mxu0 (!%p2864_p0), %v3669_v22 }
 0x1ba   : > { %2500 = vmatmul.mubr.f32.vlgmr.msra.gmra.mrb[18].mxu1 %v4577_v43  ;;  %v2516_v43 = vld [vmem:[%s4704_s4 + $0x10] sm:$0xff] (!%p2864_p0) }
 0x1bb   : > { %v3348_v29 = vpack.c.bf16 (!%p2864_p0), %v2517_v57, %v2516_v43 }
 0x1bd   : > { %3349 = vmatpush3.bf16.msra.mxu0 (!%p2864_p0), %v3348_v29 }
 0x28a   : > { %2511 = sbr.rel (%p2864_p0) target bundleno = 881 (0x371), region = 52 }
 0x28d   : > { %v2501_v49 = vpop.f32.mrb[18].mxu1 }
 0x28e   : > { %v2505_v14 = vadd.f32 %v2501_v49, %v2420_v10  ;;  %v2503_v55 = vpop.f32.mrb[19].mxu1 }
 0x290   : > { %2507 = vst.msk [vmem:[#allocation2] sm:$0x1] %vm2506_vm9, %v2505_v14 }
 0x297   : > { %v2512_v31 = vld [vmem:[#allocation2] sm:$0x1] }
 0x298   : > { %v2513_v33 = vmul.f32 0.00390625, %v2512_v31 }
 0x29a   : > { %3315 = vmatmul.mubr.msk.f32.vlgmr.msra.gmra.mrb[0].mxu0 %vm2519_vm11, %v2513_v33 }
 0x36d   : > { %v2589_v39 = vpop.f32.mrb[0].mxu0 }
 0x36e   : > { %v2590_v50 = vadd.f32 %v2589_v39, %v2518_v34  ;;  %v3316_v51 = vpop.f32.mrb[1].mxu0 }
 0x370   : > { %2594 = vst.msk [vmem:[%s3785_s20] sm:$0x1] %vm2593_vm12, %v2590_v50 }
 0x371 PF: > { %s2866_s17 = sshll.u32 %s3653_s25, 4  ;;  %s2608_s19 = sshll.u32 %s3785_s20, 4  ;;  %s2609_s19 = int_to_ptr.vmem [resolvable:$true] %s2608_s19 }
 0x372   : > { %s4650_s18 = scalar_lea.hbm %s4706_s6, %s2866_s17  ;;  %s2596_s11 = scalar_lea.sflag [#allocation4], %s254_s14 }
 0x373   : > { %s3571_s12 = scalar_lea.vmem %s2609_s19, 16  ;;  %s3672_s15 = smov [#allocation3]  }
 0x374   : > { %p3572_p1 = scmp.ne.s32.totalorder %s2609_s19, %s3571_s12  ;;  %s3575_s24 = sshll.u32 %s3672_s15, 4  ;;  %s3576_s24 = int_to_ptr.vmem [resolvable:$false] %s3575_s24 }
 0x375   : > { %s3577_s16 = scalar_lea.vmem %s3576_s24, 32  ;;  %p3578_p5 = scmp.lt.s32.totalorder %s2609_s19, %s3576_s24 }
 0x376   : > { %p3573_p2 = pnand %p3572_p1, %p3757_p3  ;;  %p3579_p6 = scmp.lt.s32.totalorder %s3577_s16, %s3571_s12 }
 0x378   : > { %p3574_p4 = pneg %p3573_p2  ;;  %p3580_p7 = por %p3579_p6, %p3578_p5 }
 0x37a   : > { %p3581_p8 = pnand %p3580_p7, %p3574_p4 }
 0x37c   : > { %3584 = shalt.err (!%p3581_p8)
}
 0x37d   : > { %s3585_s25 = scalar_lea.hbm %s4650_s18, 16  ;;  %s3589_s17 = scalar_lea.hbm %s4706_s6, 32 }
 0x37e   : > { %p3586_p10 = scmp.ne.s32.totalorder %s4650_s18, %s3585_s25  ;;  %p3590_p13 = scmp.lt.u32.totalorder %s4650_s18, %s4706_s6 }
 0x37f   : > { %p3591_p0 = scmp.lt.u32.totalorder %s3589_s17, %s3585_s25  ;;  %p3593_p2 = scmp.lt.u32.totalorder %s3585_s25, %s4650_s18 }
 0x380   : > { %p3587_p11 = pnand %p3586_p10, %p3757_p3 }
 0x381   : > { %p3592_p1 = por %p3591_p0, %p3590_p13 }
 0x382   : > { %p3588_p12 = pneg %p3587_p11 }
 0x383   : > { %p3594_p4 = por %p3593_p2, %p3592_p1 }
 0x385   : > { %p3595_p5 = pnand %p3594_p4, %p3588_p12 }
 0x387   : > { %3598 = shalt.err (!%p3595_p5)
}
 0x388   : > { %3495 = dma.vmem_to_hbm [thread:$0]  (%p3757_p3), %s2609_s19, 16, %s4650_s18, %s2596_s11  }
 0x389 PF: > { %p3501_p6 = scmp.ge.s32.totalorder %s3665_s28, 2  ;;  %s2620_s12 = sand.u32 1, %s3637_s21  }
 0x38a   : > { %s2621_s15 = scalar_lea.sflag [#allocation4], %s2620_s12 }
 0x38b   : > { %p3498_p7 = pnand %p3501_p6, %p3767_p9 }
 0x38d   : > { %3632 = dma.done.wait (!%p3498_p7), %s2621_s15, 16  }
 0x38e   : > { %3634 = vsyncadd (!%p3498_p7), %s2621_s15, 4294967280  ;;  %s19_s28 = sadd.s32 1, %s3665_s28   ;;  %s4767_s21 = smov %s3641_s22 }
 0x38f   : > { %p16_p8 = scmp.ge.s32.totalorder %s19_s28, 6   ;;  %s4768_s22 = smov %s3645_s23 }
 0x390   : > { %s4769_s23 = smov %s3775_s13  ;;  %s4770_s24 = smov %s3657_s26 }
 0x391   : > { %s4771_s25 = smov %s3661_s27  ;;  %s4772_s26 = smov %s4775_s7 }
 0x392   : > { %s4773_s27 = smov %s4779_s8  ;;  %18 = sbr.rel (!%p16_p8) target bundleno = 5 (0x5), region = 96 }
 0x399   :  { %2625 = vsyncpa [#allocation4], 1 }
 0x39a   :  { %2627 = vsyncpa [#allocation4 + $0x1], 1 }

</bundles_post_ra>
